<compile_context>
chip_gen: v7x
topology: tpu7x:2x2x1
jax: 0.10.0
libtpu: 0.0.40
codegen_flags: <defaults>
</compile_context>

<pallas_src>
import functools

import jax
import jax.numpy as jnp
from jax.experimental import pallas as pl
from jax.experimental.pallas import tpu as pltpu


def _spatial_attention_kernel(w_ref, col_ref, x_ref, o_ref, plane_ref, *,
                              W, K, HW, I_OFF):
    # w_ref    : SMEM f32[2*K*K + 1] = [w_avg (K*K), w_max (K*K), bias]
    # col_ref  : VMEM (1, HW) int32, col_ref[0, n] = n % W  (column index j)
    # x_ref    : VMEM (1, C, HW) input tile, native dtype
    # o_ref    : VMEM (1, C, HW) output tile
    # plane_ref: VMEM (2, FLEN) f32 scratch; flat zero-padded [avg, max] planes
    P = (K - 1) // 2

    x = x_ref[0]                                                  # (C, HW)

    # Channel reductions, lane-dense over HW (scales with C).
    avg = jnp.mean(x.astype(jnp.float32), axis=0, keepdims=True)  # (1, HW) f32
    mx = jnp.max(x, axis=0, keepdims=True).astype(jnp.float32)    # (1, HW) f32

    # Flat zero-padded planes: zeros everywhere except [I_OFF, I_OFF + HW),
    # which holds the row-major (H, W) map.  I_OFF is 128-aligned so the
    # interior store is a dense, unmasked vst.
    plane_ref[...] = jnp.zeros_like(plane_ref)
    plane_ref[0:1, pl.ds(I_OFF, HW)] = avg
    plane_ref[1:2, pl.ds(I_OFF, HW)] = mx
    avg_p = plane_ref[0:1, :]                                     # (1, FLEN)
    max_p = plane_ref[1:2, :]                                     # (1, FLEN)

    col = col_ref[...]                                            # (1, HW) i32
    acc = jnp.full((1, HW), w_ref[2 * K * K], dtype=jnp.float32)  # bias

    # Tap (di, dj) of the zero-padded conv == flat plane shifted by
    # (di - P) * W + (dj - P); rows out of range land in the zero halo, column
    # wrap-around is removed by the per-dj mask (applied once per dj).
    base = I_OFF - P * W - P
    for dj in range(K):
        oj = dj - P
        valid = jnp.logical_and(col >= -oj, col < W - oj)         # (1, HW) bool
        part = jnp.zeros((1, HW), dtype=jnp.float32)
        for di in range(K):
            s = base + di * W + dj                                # static offset
            part = part + w_ref[di * K + dj] * avg_p[:, s:s + HW]
            part = part + w_ref[K * K + di * K + dj] * max_p[:, s:s + HW]
        acc = acc + jnp.where(valid, part, 0.0)

    scale = jax.nn.sigmoid(acc)                                   # (1, HW) f32

    # Lane-dense multiply + store; reload x in native dtype (same VMEM block).
    o_ref[0] = (x_ref[0] * scale).astype(o_ref.dtype)


def spatial_attention(x, conv_w, conv_b, kernel_size=7):
    """x: (N, C, H, W); conv_w: (1, 2, K, K); conv_b: (1,)."""
    N, C, H, W = x.shape
    K = kernel_size
    P = (K - 1) // 2
    HW = H * W
    FLATPAD = P * W + P                        # halo needed on each side (flat)
    I_OFF = ((FLATPAD + 127) // 128) * 128     # 128-aligned interior offset
    FLEN = I_OFF + HW + FLATPAD                # flat padded plane length

    # Free reshapes only — no extra HBM pass over x.
    x_flat = x.reshape(N, C, HW)

    # Flatten params for SMEM scalar access: [w_avg, w_max, bias].
    w_flat = jnp.concatenate(
        [conv_w[0, 0].reshape(-1), conv_w[0, 1].reshape(-1),
         conv_b.reshape(-1)]).astype(jnp.float32)

    # Column index j for every flat position n (avoids in-kernel iota/mod).
    col_ids = (jnp.arange(HW, dtype=jnp.int32) % W).reshape(1, HW)

    kernel = functools.partial(_spatial_attention_kernel,
                               W=W, K=K, HW=HW, I_OFF=I_OFF)

    grid_spec = pltpu.PrefetchScalarGridSpec(
        num_scalar_prefetch=1,                 # w_flat -> SMEM
        grid=(N,),
        in_specs=[
            pl.BlockSpec((1, HW), lambda n, w: (0, 0)),          # col_ids
            pl.BlockSpec((1, C, HW), lambda n, w: (n, 0, 0)),    # x_flat
        ],
        out_specs=pl.BlockSpec((1, C, HW), lambda n, w: (n, 0, 0)),
        scratch_shapes=[pltpu.VMEM((2, FLEN), jnp.float32)],
    )

    # VMEM budget: double-buffered in + out blocks, plus tiny scratch/masks.
    elt = jnp.dtype(x.dtype).itemsize
    block_bytes = C * HW * elt
    vmem_limit = int(min(128 * 1024 * 1024,
                         max(32 * 1024 * 1024,
                             4 * block_bytes + 2 * FLEN * 4 + 2 * HW * 4
                             + (1 << 20))))

    out_flat = pl.pallas_call(
        kernel,
        out_shape=jax.ShapeDtypeStruct((N, C, HW), x.dtype),
        grid_spec=grid_spec,
        compiler_params=pltpu.CompilerParams(
            dimension_semantics=("parallel",),   # batch across TCs on v7x
            vmem_limit_bytes=vmem_limit),
    )(w_flat, col_ids, x_flat)

    return out_flat.reshape(N, C, H, W)


def _reference(x, conv_w, conv_b):
    # Pure-JAX reference of the PyTorch forward for verification.
    y_avg = jnp.mean(x, axis=1, keepdims=True)
    y_max = jnp.max(x, axis=1, keepdims=True)
    y = jnp.concatenate([y_avg, y_max], axis=1)
    p = (conv_w.shape[-1] - 1) // 2
    y = jax.lax.conv_general_dilated(
        y, conv_w, window_strides=(1, 1), padding=[(p, p), (p, p)],
        dimension_numbers=("NCHW", "OIHW", "NCHW"))
    y = y + conv_b.reshape(1, -1, 1, 1)
    return x * jax.nn.sigmoid(y)


if __name__ == "__main__":
    N, C, H, W = 2, 4, 16, 16
    K = 7

    key = jax.random.PRNGKey(0)
    kx, kw, kb = jax.random.split(key, 3)

    x = jax.random.normal(kx, (N, C, H, W), dtype=jnp.float32)

    # Deterministic synthetic Conv2d(2 -> 1, k=7) params (PyTorch-like init).
    fan_in = 2 * K * K
    bound = 1.0 / jnp.sqrt(jnp.float32(fan_in))
    conv_w = jax.random.uniform(kw, (1, 2, K, K), jnp.float32, -bound, bound)
    conv_b = jax.random.uniform(kb, (1,), jnp.float32, -bound, bound)

    out = jax.block_until_ready(spatial_attention(x, conv_w, conv_b, K))
    ref = jax.block_until_ready(_reference(x, conv_w, conv_b))

    assert out.shape == (N, C, H, W) and out.dtype == x.dtype
    assert jnp.allclose(out, ref, atol=1e-5, rtol=1e-5), \
        f"max abs err = {jnp.max(jnp.abs(out - ref))}"

    # TODO(synk): self.norm (BatchNorm2d) is unused in the PyTorch forward, so
    # it is intentionally not implemented.
    print("KERNEL_OK")
</pallas_src>

<mosaic_0001>
module attributes {stable_mosaic.version = 11 : i64} {
  func.func @_spatial_attention_kernel(%arg0: i32, %arg1: memref<99xf32, #tpu.memory_space<smem>>, %arg2: memref<1x256xi32, #tpu.memory_space<vmem>>, %arg3: memref<1x4x256xf32, #tpu.memory_space<vmem>>, %arg4: memref<1x4x256xf32, #tpu.memory_space<vmem>>, %arg5: memref<2x435xf32, #tpu.memory_space<vmem>>) attributes {dimension_semantics = [#tpu.dimension_semantics<parallel>], iteration_bounds = array<i64: 2>, scalar_prefetch = 1 : i64, scratch_operands = 1 : i64, tpu.core_type = #tpu.core_type<tc>, window_params = [{pipeline_mode = #tpu.pipeline_mode<synchronous>, transform_indices = @transform_0, window_bounds = array<i64: 1, 256>}, {transform_indices = @transform_1, window_bounds = array<i64: 1, 4, 256>}, {transform_indices = @transform_2, window_bounds = array<i64: 1, 4, 256>}]} {
    %c0 = arith.constant 0 : index
    %c0_0 = arith.constant 0 : index
    %c0_1 = arith.constant 0 : index
    %0 = vector.load %arg3[%c0, %c0_0, %c0_1] : memref<1x4x256xf32, #tpu.memory_space<vmem>>, vector<1x4x256xf32>
    %1 = vector.shape_cast %0 : vector<1x4x256xf32> to vector<4x256xf32>
    %cst = arith.constant dense<0.000000e+00> : vector<256xf32>
    %2 = vector.multi_reduction <add>, %1, %cst [0] : vector<4x256xf32> to vector<256xf32>
    %3 = vector.shape_cast %2 : vector<256xf32> to vector<1x256xf32>
    %cst_2 = arith.constant 4.000000e+00 : f32
    %4 = vector.broadcast %cst_2 : f32 to vector<1x256xf32>
    %5 = arith.divf %3, %4 : vector<1x256xf32>
    %cst_3 = arith.constant dense<0xFF800000> : vector<256xf32>
    %6 = vector.multi_reduction <maximumf>, %1, %cst_3 [0] : vector<4x256xf32> to vector<256xf32>
    %7 = vector.shape_cast %6 : vector<256xf32> to vector<1x256xf32>
    %cst_4 = arith.constant 0.000000e+00 : f32
    %8 = vector.broadcast %cst_4 : f32 to vector<2x435xf32>
    %c0_5 = arith.constant 0 : index
    %c0_6 = arith.constant 0 : index
    %9 = vector.load %arg5[%c0_5, %c0_6] : memref<2x435xf32, #tpu.memory_space<vmem>>, vector<2x435xf32>
    tpu.vector_store %arg5[%c0_5, %c0_6], %8 {strides = array<i32>} : memref<2x435xf32, #tpu.memory_space<vmem>>, vector<2x435xf32>,
    %c0_7 = arith.constant 0 : index
    %c128 = arith.constant 128 : index
    %10 = vector.load %arg5[%c0_7, %c128] : memref<2x435xf32, #tpu.memory_space<vmem>>, vector<1x256xf32>
    tpu.vector_store %arg5[%c0_7, %c128], %5 {strides = array<i32>} : memref<2x435xf32, #tpu.memory_space<vmem>>, vector<1x256xf32>,
    %c1 = arith.constant 1 : index
    %c128_8 = arith.constant 128 : index
    %11 = vector.load %arg5[%c1, %c128_8] : memref<2x435xf32, #tpu.memory_space<vmem>>, vector<1x256xf32>
    tpu.vector_store %arg5[%c1, %c128_8], %7 {strides = array<i32>} : memref<2x435xf32, #tpu.memory_space<vmem>>, vector<1x256xf32>,
    %c0_9 = arith.constant 0 : index
    %c0_10 = arith.constant 0 : index
    %12 = vector.load %arg5[%c0_9, %c0_10] : memref<2x435xf32, #tpu.memory_space<vmem>>, vector<1x435xf32>
    %c1_11 = arith.constant 1 : index
    %c0_12 = arith.constant 0 : index
    %13 = vector.load %arg5[%c1_11, %c0_12] : memref<2x435xf32, #tpu.memory_space<vmem>>, vector<1x435xf32>
    %c0_13 = arith.constant 0 : index
    %c0_14 = arith.constant 0 : index
    %14 = vector.load %arg2[%c0_13, %c0_14] : memref<1x256xi32, #tpu.memory_space<vmem>>, vector<1x256xi32>
    %c98 = arith.constant 98 : index
    %15 = memref.load %arg1[%c98] : memref<99xf32, #tpu.memory_space<smem>>
    %16 = vector.broadcast %15 : f32 to vector<1x256xf32>
    %c3_i32 = arith.constant 3 : i32
    %17 = vector.broadcast %c3_i32 : i32 to vector<1x256xi32>
    %18 = arith.cmpi sge, %14, %17 : vector<1x256xi32>
    %c19_i32 = arith.constant 19 : i32
    %19 = vector.broadcast %c19_i32 : i32 to vector<1x256xi32>
    %20 = arith.cmpi slt, %14, %19 : vector<1x256xi32>
    %21 = arith.andi %18, %20 : vector<1x256xi1>
    %cst_15 = arith.constant 0.000000e+00 : f32
    %22 = vector.broadcast %cst_15 : f32 to vector<1x256xf32>
    %c0_16 = arith.constant 0 : index
    %23 = memref.load %arg1[%c0_16] : memref<99xf32, #tpu.memory_space<smem>>
    %24 = vector.extract_strided_slice %12 {offsets = [0, 77], sizes = [1, 256], strides = [1, 1]} : vector<1x435xf32> to vector<1x256xf32>
    %25 = vector.broadcast %23 : f32 to vector<1x256xf32>
    %26 = arith.mulf %25, %24 : vector<1x256xf32>
    %27 = arith.addf %22, %26 : vector<1x256xf32>
    %c49 = arith.constant 49 : index
    %28 = memref.load %arg1[%c49] : memref<99xf32, #tpu.memory_space<smem>>
    %29 = vector.extract_strided_slice %13 {offsets = [0, 77], sizes = [1, 256], strides = [1, 1]} : vector<1x435xf32> to vector<1x256xf32>
    %30 = vector.broadcast %28 : f32 to vector<1x256xf32>
    %31 = arith.mulf %30, %29 : vector<1x256xf32>
    %32 = arith.addf %27, %31 : vector<1x256xf32>
    %c7 = arith.constant 7 : index
    %33 = memref.load %arg1[%c7] : memref<99xf32, #tpu.memory_space<smem>>
    %34 = vector.extract_strided_slice %12 {offsets = [0, 93], sizes = [1, 256], strides = [1, 1]} : vector<1x435xf32> to vector<1x256xf32>
    %35 = vector.broadcast %33 : f32 to vector<1x256xf32>
    %36 = arith.mulf %35, %34 : vector<1x256xf32>
    %37 = arith.addf %32, %36 : vector<1x256xf32>
    %c56 = arith.constant 56 : index
    %38 = memref.load %arg1[%c56] : memref<99xf32, #tpu.memory_space<smem>>
    %39 = vector.extract_strided_slice %13 {offsets = [0, 93], sizes = [1, 256], strides = [1, 1]} : vector<1x435xf32> to vector<1x256xf32>
    %40 = vector.broadcast %38 : f32 to vector<1x256xf32>
    %41 = arith.mulf %40, %39 : vector<1x256xf32>
    %42 = arith.addf %37, %41 : vector<1x256xf32>
    %c14 = arith.constant 14 : index
    %43 = memref.load %arg1[%c14] : memref<99xf32, #tpu.memory_space<smem>>
    %44 = vector.extract_strided_slice %12 {offsets = [0, 109], sizes = [1, 256], strides = [1, 1]} : vector<1x435xf32> to vector<1x256xf32>
    %45 = vector.broadcast %43 : f32 to vector<1x256xf32>
    %46 = arith.mulf %45, %44 : vector<1x256xf32>
    %47 = arith.addf %42, %46 : vector<1x256xf32>
    %c63 = arith.constant 63 : index
    %48 = memref.load %arg1[%c63] : memref<99xf32, #tpu.memory_space<smem>>
    %49 = vector.extract_strided_slice %13 {offsets = [0, 109], sizes = [1, 256], strides = [1, 1]} : vector<1x435xf32> to vector<1x256xf32>
    %50 = vector.broadcast %48 : f32 to vector<1x256xf32>
    %51 = arith.mulf %50, %49 : vector<1x256xf32>
    %52 = arith.addf %47, %51 : vector<1x256xf32>
    %c21 = arith.constant 21 : index
    %53 = memref.load %arg1[%c21] : memref<99xf32, #tpu.memory_space<smem>>
    %54 = vector.extract_strided_slice %12 {offsets = [0, 125], sizes = [1, 256], strides = [1, 1]} : vector<1x435xf32> to vector<1x256xf32>
    %55 = vector.broadcast %53 : f32 to vector<1x256xf32>
    %56 = arith.mulf %55, %54 : vector<1x256xf32>
    %57 = arith.addf %52, %56 : vector<1x256xf32>
    %c70 = arith.constant 70 : index
    %58 = memref.load %arg1[%c70] : memref<99xf32, #tpu.memory_space<smem>>
    %59 = vector.extract_strided_slice %13 {offsets = [0, 125], sizes = [1, 256], strides = [1, 1]} : vector<1x435xf32> to vector<1x256xf32>
    %60 = vector.broadcast %58 : f32 to vector<1x256xf32>
    %61 = arith.mulf %60, %59 : vector<1x256xf32>
    %62 = arith.addf %57, %61 : vector<1x256xf32>
    %c28 = arith.constant 28 : index
    %63 = memref.load %arg1[%c28] : memref<99xf32, #tpu.memory_space<smem>>
    %64 = vector.extract_strided_slice %12 {offsets = [0, 141], sizes = [1, 256], strides = [1, 1]} : vector<1x435xf32> to vector<1x256xf32>
    %65 = vector.broadcast %63 : f32 to vector<1x256xf32>
    %66 = arith.mulf %65, %64 : vector<1x256xf32>
    %67 = arith.addf %62, %66 : vector<1x256xf32>
    %c77 = arith.constant 77 : index
    %68 = memref.load %arg1[%c77] : memref<99xf32, #tpu.memory_space<smem>>
    %69 = vector.extract_strided_slice %13 {offsets = [0, 141], sizes = [1, 256], strides = [1, 1]} : vector<1x435xf32> to vector<1x256xf32>
    %70 = vector.broadcast %68 : f32 to vector<1x256xf32>
    %71 = arith.mulf %70, %69 : vector<1x256xf32>
    %72 = arith.addf %67, %71 : vector<1x256xf32>
    %c35 = arith.constant 35 : index
    %73 = memref.load %arg1[%c35] : memref<99xf32, #tpu.memory_space<smem>>
    %74 = vector.extract_strided_slice %12 {offsets = [0, 157], sizes = [1, 256], strides = [1, 1]} : vector<1x435xf32> to vector<1x256xf32>
    %75 = vector.broadcast %73 : f32 to vector<1x256xf32>
    %76 = arith.mulf %75, %74 : vector<1x256xf32>
    %77 = arith.addf %72, %76 : vector<1x256xf32>
    %c84 = arith.constant 84 : index
    %78 = memref.load %arg1[%c84] : memref<99xf32, #tpu.memory_space<smem>>
    %79 = vector.extract_strided_slice %13 {offsets = [0, 157], sizes = [1, 256], strides = [1, 1]} : vector<1x435xf32> to vector<1x256xf32>
    %80 = vector.broadcast %78 : f32 to vector<1x256xf32>
    %81 = arith.mulf %80, %79 : vector<1x256xf32>
    %82 = arith.addf %77, %81 : vector<1x256xf32>
    %c42 = arith.constant 42 : index
    %83 = memref.load %arg1[%c42] : memref<99xf32, #tpu.memory_space<smem>>
    %84 = vector.extract_strided_slice %12 {offsets = [0, 173], sizes = [1, 256], strides = [1, 1]} : vector<1x435xf32> to vector<1x256xf32>
    %85 = vector.broadcast %83 : f32 to vector<1x256xf32>
    %86 = arith.mulf %85, %84 : vector<1x256xf32>
    %87 = arith.addf %82, %86 : vector<1x256xf32>
    %c91 = arith.constant 91 : index
    %88 = memref.load %arg1[%c91] : memref<99xf32, #tpu.memory_space<smem>>
    %89 = vector.extract_strided_slice %13 {offsets = [0, 173], sizes = [1, 256], strides = [1, 1]} : vector<1x435xf32> to vector<1x256xf32>
    %90 = vector.broadcast %88 : f32 to vector<1x256xf32>
    %91 = arith.mulf %90, %89 : vector<1x256xf32>
    %92 = arith.addf %87, %91 : vector<1x256xf32>
    %cst_17 = arith.constant 0.000000e+00 : f32
    %93 = vector.broadcast %cst_17 : f32 to vector<1x256xf32>
    %94 = arith.select %21, %92, %93 : vector<1x256xi1>, vector<1x256xf32>
    %95 = arith.addf %16, %94 : vector<1x256xf32>
    %c2_i32 = arith.constant 2 : i32
    %96 = vector.broadcast %c2_i32 : i32 to vector<1x256xi32>
    %97 = arith.cmpi sge, %14, %96 : vector<1x256xi32>
    %c18_i32 = arith.constant 18 : i32
    %98 = vector.broadcast %c18_i32 : i32 to vector<1x256xi32>
    %99 = arith.cmpi slt, %14, %98 : vector<1x256xi32>
    %100 = arith.andi %97, %99 : vector<1x256xi1>
    %cst_18 = arith.constant 0.000000e+00 : f32
    %101 = vector.broadcast %cst_18 : f32 to vector<1x256xf32>
    %c1_19 = arith.constant 1 : index
    %102 = memref.load %arg1[%c1_19] : memref<99xf32, #tpu.memory_space<smem>>
    %103 = vector.extract_strided_slice %12 {offsets = [0, 78], sizes = [1, 256], strides = [1, 1]} : vector<1x435xf32> to vector<1x256xf32>
    %104 = vector.broadcast %102 : f32 to vector<1x256xf32>
    %105 = arith.mulf %104, %103 : vector<1x256xf32>
    %106 = arith.addf %101, %105 : vector<1x256xf32>
    %c50 = arith.constant 50 : index
    %107 = memref.load %arg1[%c50] : memref<99xf32, #tpu.memory_space<smem>>
    %108 = vector.extract_strided_slice %13 {offsets = [0, 78], sizes = [1, 256], strides = [1, 1]} : vector<1x435xf32> to vector<1x256xf32>
    %109 = vector.broadcast %107 : f32 to vector<1x256xf32>
    %110 = arith.mulf %109, %108 : vector<1x256xf32>
    %111 = arith.addf %106, %110 : vector<1x256xf32>
    %c8 = arith.constant 8 : index
    %112 = memref.load %arg1[%c8] : memref<99xf32, #tpu.memory_space<smem>>
    %113 = vector.extract_strided_slice %12 {offsets = [0, 94], sizes = [1, 256], strides = [1, 1]} : vector<1x435xf32> to vector<1x256xf32>
    %114 = vector.broadcast %112 : f32 to vector<1x256xf32>
    %115 = arith.mulf %114, %113 : vector<1x256xf32>
    %116 = arith.addf %111, %115 : vector<1x256xf32>
    %c57 = arith.constant 57 : index
    %117 = memref.load %arg1[%c57] : memref<99xf32, #tpu.memory_space<smem>>
    %118 = vector.extract_strided_slice %13 {offsets = [0, 94], sizes = [1, 256], strides = [1, 1]} : vector<1x435xf32> to vector<1x256xf32>
    %119 = vector.broadcast %117 : f32 to vector<1x256xf32>
    %120 = arith.mulf %119, %118 : vector<1x256xf32>
    %121 = arith.addf %116, %120 : vector<1x256xf32>
    %c15 = arith.constant 15 : index
    %122 = memref.load %arg1[%c15] : memref<99xf32, #tpu.memory_space<smem>>
    %123 = vector.extract_strided_slice %12 {offsets = [0, 110], sizes = [1, 256], strides = [1, 1]} : vector<1x435xf32> to vector<1x256xf32>
    %124 = vector.broadcast %122 : f32 to vector<1x256xf32>
    %125 = arith.mulf %124, %123 : vector<1x256xf32>
    %126 = arith.addf %121, %125 : vector<1x256xf32>
    %c64 = arith.constant 64 : index
    %127 = memref.load %arg1[%c64] : memref<99xf32, #tpu.memory_space<smem>>
    %128 = vector.extract_strided_slice %13 {offsets = [0, 110], sizes = [1, 256], strides = [1, 1]} : vector<1x435xf32> to vector<1x256xf32>
    %129 = vector.broadcast %127 : f32 to vector<1x256xf32>
    %130 = arith.mulf %129, %128 : vector<1x256xf32>
    %131 = arith.addf %126, %130 : vector<1x256xf32>
    %c22 = arith.constant 22 : index
    %132 = memref.load %arg1[%c22] : memref<99xf32, #tpu.memory_space<smem>>
    %133 = vector.extract_strided_slice %12 {offsets = [0, 126], sizes = [1, 256], strides = [1, 1]} : vector<1x435xf32> to vector<1x256xf32>
    %134 = vector.broadcast %132 : f32 to vector<1x256xf32>
    %135 = arith.mulf %134, %133 : vector<1x256xf32>
    %136 = arith.addf %131, %135 : vector<1x256xf32>
    %c71 = arith.constant 71 : index
    %137 = memref.load %arg1[%c71] : memref<99xf32, #tpu.memory_space<smem>>
    %138 = vector.extract_strided_slice %13 {offsets = [0, 126], sizes = [1, 256], strides = [1, 1]} : vector<1x435xf32> to vector<1x256xf32>
    %139 = vector.broadcast %137 : f32 to vector<1x256xf32>
    %140 = arith.mulf %139, %138 : vector<1x256xf32>
    %141 = arith.addf %136, %140 : vector<1x256xf32>
    %c29 = arith.constant 29 : index
    %142 = memref.load %arg1[%c29] : memref<99xf32, #tpu.memory_space<smem>>
    %143 = vector.extract_strided_slice %12 {offsets = [0, 142], sizes = [1, 256], strides = [1, 1]} : vector<1x435xf32> to vector<1x256xf32>
    %144 = vector.broadcast %142 : f32 to vector<1x256xf32>
    %145 = arith.mulf %144, %143 : vector<1x256xf32>
    %146 = arith.addf %141, %145 : vector<1x256xf32>
    %c78 = arith.constant 78 : index
    %147 = memref.load %arg1[%c78] : memref<99xf32, #tpu.memory_space<smem>>
    %148 = vector.extract_strided_slice %13 {offsets = [0, 142], sizes = [1, 256], strides = [1, 1]} : vector<1x435xf32> to vector<1x256xf32>
    %149 = vector.broadcast %147 : f32 to vector<1x256xf32>
    %150 = arith.mulf %149, %148 : vector<1x256xf32>
    %151 = arith.addf %146, %150 : vector<1x256xf32>
    %c36 = arith.constant 36 : index
    %152 = memref.load %arg1[%c36] : memref<99xf32, #tpu.memory_space<smem>>
    %153 = vector.extract_strided_slice %12 {offsets = [0, 158], sizes = [1, 256], strides = [1, 1]} : vector<1x435xf32> to vector<1x256xf32>
    %154 = vector.broadcast %152 : f32 to vector<1x256xf32>
    %155 = arith.mulf %154, %153 : vector<1x256xf32>
    %156 = arith.addf %151, %155 : vector<1x256xf32>
    %c85 = arith.constant 85 : index
    %157 = memref.load %arg1[%c85] : memref<99xf32, #tpu.memory_space<smem>>
    %158 = vector.extract_strided_slice %13 {offsets = [0, 158], sizes = [1, 256], strides = [1, 1]} : vector<1x435xf32> to vector<1x256xf32>
    %159 = vector.broadcast %157 : f32 to vector<1x256xf32>
    %160 = arith.mulf %159, %158 : vector<1x256xf32>
    %161 = arith.addf %156, %160 : vector<1x256xf32>
    %c43 = arith.constant 43 : index
    %162 = memref.load %arg1[%c43] : memref<99xf32, #tpu.memory_space<smem>>
    %163 = vector.extract_strided_slice %12 {offsets = [0, 174], sizes = [1, 256], strides = [1, 1]} : vector<1x435xf32> to vector<1x256xf32>
    %164 = vector.broadcast %162 : f32 to vector<1x256xf32>
    %165 = arith.mulf %164, %163 : vector<1x256xf32>
    %166 = arith.addf %161, %165 : vector<1x256xf32>
    %c92 = arith.constant 92 : index
    %167 = memref.load %arg1[%c92] : memref<99xf32, #tpu.memory_space<smem>>
    %168 = vector.extract_strided_slice %13 {offsets = [0, 174], sizes = [1, 256], strides = [1, 1]} : vector<1x435xf32> to vector<1x256xf32>
    %169 = vector.broadcast %167 : f32 to vector<1x256xf32>
    %170 = arith.mulf %169, %168 : vector<1x256xf32>
    %171 = arith.addf %166, %170 : vector<1x256xf32>
    %cst_20 = arith.constant 0.000000e+00 : f32
    %172 = vector.broadcast %cst_20 : f32 to vector<1x256xf32>
    %173 = arith.select %100, %171, %172 : vector<1x256xi1>, vector<1x256xf32>
    %174 = arith.addf %95, %173 : vector<1x256xf32>
    %c1_i32 = arith.constant 1 : i32
    %175 = vector.broadcast %c1_i32 : i32 to vector<1x256xi32>
    %176 = arith.cmpi sge, %14, %175 : vector<1x256xi32>
    %c17_i32 = arith.constant 17 : i32
    %177 = vector.broadcast %c17_i32 : i32 to vector<1x256xi32>
    %178 = arith.cmpi slt, %14, %177 : vector<1x256xi32>
    %179 = arith.andi %176, %178 : vector<1x256xi1>
    %cst_21 = arith.constant 0.000000e+00 : f32
    %180 = vector.broadcast %cst_21 : f32 to vector<1x256xf32>
    %c2 = arith.constant 2 : index
    %181 = memref.load %arg1[%c2] : memref<99xf32, #tpu.memory_space<smem>>
    %182 = vector.extract_strided_slice %12 {offsets = [0, 79], sizes = [1, 256], strides = [1, 1]} : vector<1x435xf32> to vector<1x256xf32>
    %183 = vector.broadcast %181 : f32 to vector<1x256xf32>
    %184 = arith.mulf %183, %182 : vector<1x256xf32>
    %185 = arith.addf %180, %184 : vector<1x256xf32>
    %c51 = arith.constant 51 : index
    %186 = memref.load %arg1[%c51] : memref<99xf32, #tpu.memory_space<smem>>
    %187 = vector.extract_strided_slice %13 {offsets = [0, 79], sizes = [1, 256], strides = [1, 1]} : vector<1x435xf32> to vector<1x256xf32>
    %188 = vector.broadcast %186 : f32 to vector<1x256xf32>
    %189 = arith.mulf %188, %187 : vector<1x256xf32>
    %190 = arith.addf %185, %189 : vector<1x256xf32>
    %c9 = arith.constant 9 : index
    %191 = memref.load %arg1[%c9] : memref<99xf32, #tpu.memory_space<smem>>
    %192 = vector.extract_strided_slice %12 {offsets = [0, 95], sizes = [1, 256], strides = [1, 1]} : vector<1x435xf32> to vector<1x256xf32>
    %193 = vector.broadcast %191 : f32 to vector<1x256xf32>
    %194 = arith.mulf %193, %192 : vector<1x256xf32>
    %195 = arith.addf %190, %194 : vector<1x256xf32>
    %c58 = arith.constant 58 : index
    %196 = memref.load %arg1[%c58] : memref<99xf32, #tpu.memory_space<smem>>
    %197 = vector.extract_strided_slice %13 {offsets = [0, 95], sizes = [1, 256], strides = [1, 1]} : vector<1x435xf32> to vector<1x256xf32>
    %198 = vector.broadcast %196 : f32 to vector<1x256xf32>
    %199 = arith.mulf %198, %197 : vector<1x256xf32>
    %200 = arith.addf %195, %199 : vector<1x256xf32>
    %c16 = arith.constant 16 : index
    %201 = memref.load %arg1[%c16] : memref<99xf32, #tpu.memory_space<smem>>
    %202 = vector.extract_strided_slice %12 {offsets = [0, 111], sizes = [1, 256], strides = [1, 1]} : vector<1x435xf32> to vector<1x256xf32>
    %203 = vector.broadcast %201 : f32 to vector<1x256xf32>
    %204 = arith.mulf %203, %202 : vector<1x256xf32>
    %205 = arith.addf %200, %204 : vector<1x256xf32>
    %c65 = arith.constant 65 : index
    %206 = memref.load %arg1[%c65] : memref<99xf32, #tpu.memory_space<smem>>
    %207 = vector.extract_strided_slice %13 {offsets = [0, 111], sizes = [1, 256], strides = [1, 1]} : vector<1x435xf32> to vector<1x256xf32>
    %208 = vector.broadcast %206 : f32 to vector<1x256xf32>
    %209 = arith.mulf %208, %207 : vector<1x256xf32>
    %210 = arith.addf %205, %209 : vector<1x256xf32>
    %c23 = arith.constant 23 : index
    %211 = memref.load %arg1[%c23] : memref<99xf32, #tpu.memory_space<smem>>
    %212 = vector.extract_strided_slice %12 {offsets = [0, 127], sizes = [1, 256], strides = [1, 1]} : vector<1x435xf32> to vector<1x256xf32>
    %213 = vector.broadcast %211 : f32 to vector<1x256xf32>
    %214 = arith.mulf %213, %212 : vector<1x256xf32>
    %215 = arith.addf %210, %214 : vector<1x256xf32>
    %c72 = arith.constant 72 : index
    %216 = memref.load %arg1[%c72] : memref<99xf32, #tpu.memory_space<smem>>
    %217 = vector.extract_strided_slice %13 {offsets = [0, 127], sizes = [1, 256], strides = [1, 1]} : vector<1x435xf32> to vector<1x256xf32>
    %218 = vector.broadcast %216 : f32 to vector<1x256xf32>
    %219 = arith.mulf %218, %217 : vector<1x256xf32>
    %220 = arith.addf %215, %219 : vector<1x256xf32>
    %c30 = arith.constant 30 : index
    %221 = memref.load %arg1[%c30] : memref<99xf32, #tpu.memory_space<smem>>
    %222 = vector.extract_strided_slice %12 {offsets = [0, 143], sizes = [1, 256], strides = [1, 1]} : vector<1x435xf32> to vector<1x256xf32>
    %223 = vector.broadcast %221 : f32 to vector<1x256xf32>
    %224 = arith.mulf %223, %222 : vector<1x256xf32>
    %225 = arith.addf %220, %224 : vector<1x256xf32>
    %c79 = arith.constant 79 : index
    %226 = memref.load %arg1[%c79] : memref<99xf32, #tpu.memory_space<smem>>
    %227 = vector.extract_strided_slice %13 {offsets = [0, 143], sizes = [1, 256], strides = [1, 1]} : vector<1x435xf32> to vector<1x256xf32>
    %228 = vector.broadcast %226 : f32 to vector<1x256xf32>
    %229 = arith.mulf %228, %227 : vector<1x256xf32>
    %230 = arith.addf %225, %229 : vector<1x256xf32>
    %c37 = arith.constant 37 : index
    %231 = memref.load %arg1[%c37] : memref<99xf32, #tpu.memory_space<smem>>
    %232 = vector.extract_strided_slice %12 {offsets = [0, 159], sizes = [1, 256], strides = [1, 1]} : vector<1x435xf32> to vector<1x256xf32>
    %233 = vector.broadcast %231 : f32 to vector<1x256xf32>
    %234 = arith.mulf %233, %232 : vector<1x256xf32>
    %235 = arith.addf %230, %234 : vector<1x256xf32>
    %c86 = arith.constant 86 : index
    %236 = memref.load %arg1[%c86] : memref<99xf32, #tpu.memory_space<smem>>
    %237 = vector.extract_strided_slice %13 {offsets = [0, 159], sizes = [1, 256], strides = [1, 1]} : vector<1x435xf32> to vector<1x256xf32>
    %238 = vector.broadcast %236 : f32 to vector<1x256xf32>
    %239 = arith.mulf %238, %237 : vector<1x256xf32>
    %240 = arith.addf %235, %239 : vector<1x256xf32>
    %c44 = arith.constant 44 : index
    %241 = memref.load %arg1[%c44] : memref<99xf32, #tpu.memory_space<smem>>
    %242 = vector.extract_strided_slice %12 {offsets = [0, 175], sizes = [1, 256], strides = [1, 1]} : vector<1x435xf32> to vector<1x256xf32>
    %243 = vector.broadcast %241 : f32 to vector<1x256xf32>
    %244 = arith.mulf %243, %242 : vector<1x256xf32>
    %245 = arith.addf %240, %244 : vector<1x256xf32>
    %c93 = arith.constant 93 : index
    %246 = memref.load %arg1[%c93] : memref<99xf32, #tpu.memory_space<smem>>
    %247 = vector.extract_strided_slice %13 {offsets = [0, 175], sizes = [1, 256], strides = [1, 1]} : vector<1x435xf32> to vector<1x256xf32>
    %248 = vector.broadcast %246 : f32 to vector<1x256xf32>
    %249 = arith.mulf %248, %247 : vector<1x256xf32>
    %250 = arith.addf %245, %249 : vector<1x256xf32>
    %cst_22 = arith.constant 0.000000e+00 : f32
    %251 = vector.broadcast %cst_22 : f32 to vector<1x256xf32>
    %252 = arith.select %179, %250, %251 : vector<1x256xi1>, vector<1x256xf32>
    %253 = arith.addf %174, %252 : vector<1x256xf32>
    %c0_i32 = arith.constant 0 : i32
    %254 = vector.broadcast %c0_i32 : i32 to vector<1x256xi32>
    %255 = arith.cmpi sge, %14, %254 : vector<1x256xi32>
    %c16_i32 = arith.constant 16 : i32
    %256 = vector.broadcast %c16_i32 : i32 to vector<1x256xi32>
    %257 = arith.cmpi slt, %14, %256 : vector<1x256xi32>
    %258 = arith.andi %255, %257 : vector<1x256xi1>
    %cst_23 = arith.constant 0.000000e+00 : f32
    %259 = vector.broadcast %cst_23 : f32 to vector<1x256xf32>
    %c3 = arith.constant 3 : index
    %260 = memref.load %arg1[%c3] : memref<99xf32, #tpu.memory_space<smem>>
    %261 = vector.extract_strided_slice %12 {offsets = [0, 80], sizes = [1, 256], strides = [1, 1]} : vector<1x435xf32> to vector<1x256xf32>
    %262 = vector.broadcast %260 : f32 to vector<1x256xf32>
    %263 = arith.mulf %262, %261 : vector<1x256xf32>
    %264 = arith.addf %259, %263 : vector<1x256xf32>
    %c52 = arith.constant 52 : index
    %265 = memref.load %arg1[%c52] : memref<99xf32, #tpu.memory_space<smem>>
    %266 = vector.extract_strided_slice %13 {offsets = [0, 80], sizes = [1, 256], strides = [1, 1]} : vector<1x435xf32> to vector<1x256xf32>
    %267 = vector.broadcast %265 : f32 to vector<1x256xf32>
    %268 = arith.mulf %267, %266 : vector<1x256xf32>
    %269 = arith.addf %264, %268 : vector<1x256xf32>
    %c10 = arith.constant 10 : index
    %270 = memref.load %arg1[%c10] : memref<99xf32, #tpu.memory_space<smem>>
    %271 = vector.extract_strided_slice %12 {offsets = [0, 96], sizes = [1, 256], strides = [1, 1]} : vector<1x435xf32> to vector<1x256xf32>
    %272 = vector.broadcast %270 : f32 to vector<1x256xf32>
    %273 = arith.mulf %272, %271 : vector<1x256xf32>
    %274 = arith.addf %269, %273 : vector<1x256xf32>
    %c59 = arith.constant 59 : index
    %275 = memref.load %arg1[%c59] : memref<99xf32, #tpu.memory_space<smem>>
    %276 = vector.extract_strided_slice %13 {offsets = [0, 96], sizes = [1, 256], strides = [1, 1]} : vector<1x435xf32> to vector<1x256xf32>
    %277 = vector.broadcast %275 : f32 to vector<1x256xf32>
    %278 = arith.mulf %277, %276 : vector<1x256xf32>
    %279 = arith.addf %274, %278 : vector<1x256xf32>
    %c17 = arith.constant 17 : index
    %280 = memref.load %arg1[%c17] : memref<99xf32, #tpu.memory_space<smem>>
    %281 = vector.extract_strided_slice %12 {offsets = [0, 112], sizes = [1, 256], strides = [1, 1]} : vector<1x435xf32> to vector<1x256xf32>
    %282 = vector.broadcast %280 : f32 to vector<1x256xf32>
    %283 = arith.mulf %282, %281 : vector<1x256xf32>
    %284 = arith.addf %279, %283 : vector<1x256xf32>
    %c66 = arith.constant 66 : index
    %285 = memref.load %arg1[%c66] : memref<99xf32, #tpu.memory_space<smem>>
    %286 = vector.extract_strided_slice %13 {offsets = [0, 112], sizes = [1, 256], strides = [1, 1]} : vector<1x435xf32> to vector<1x256xf32>
    %287 = vector.broadcast %285 : f32 to vector<1x256xf32>
    %288 = arith.mulf %287, %286 : vector<1x256xf32>
    %289 = arith.addf %284, %288 : vector<1x256xf32>
    %c24 = arith.constant 24 : index
    %290 = memref.load %arg1[%c24] : memref<99xf32, #tpu.memory_space<smem>>
    %291 = vector.extract_strided_slice %12 {offsets = [0, 128], sizes = [1, 256], strides = [1, 1]} : vector<1x435xf32> to vector<1x256xf32>
    %292 = vector.broadcast %290 : f32 to vector<1x256xf32>
    %293 = arith.mulf %292, %291 : vector<1x256xf32>
    %294 = arith.addf %289, %293 : vector<1x256xf32>
    %c73 = arith.constant 73 : index
    %295 = memref.load %arg1[%c73] : memref<99xf32, #tpu.memory_space<smem>>
    %296 = vector.extract_strided_slice %13 {offsets = [0, 128], sizes = [1, 256], strides = [1, 1]} : vector<1x435xf32> to vector<1x256xf32>
    %297 = vector.broadcast %295 : f32 to vector<1x256xf32>
    %298 = arith.mulf %297, %296 : vector<1x256xf32>
    %299 = arith.addf %294, %298 : vector<1x256xf32>
    %c31 = arith.constant 31 : index
    %300 = memref.load %arg1[%c31] : memref<99xf32, #tpu.memory_space<smem>>
    %301 = vector.extract_strided_slice %12 {offsets = [0, 144], sizes = [1, 256], strides = [1, 1]} : vector<1x435xf32> to vector<1x256xf32>
    %302 = vector.broadcast %300 : f32 to vector<1x256xf32>
    %303 = arith.mulf %302, %301 : vector<1x256xf32>
    %304 = arith.addf %299, %303 : vector<1x256xf32>
    %c80 = arith.constant 80 : index
    %305 = memref.load %arg1[%c80] : memref<99xf32, #tpu.memory_space<smem>>
    %306 = vector.extract_strided_slice %13 {offsets = [0, 144], sizes = [1, 256], strides = [1, 1]} : vector<1x435xf32> to vector<1x256xf32>
    %307 = vector.broadcast %305 : f32 to vector<1x256xf32>
    %308 = arith.mulf %307, %306 : vector<1x256xf32>
    %309 = arith.addf %304, %308 : vector<1x256xf32>
    %c38 = arith.constant 38 : index
    %310 = memref.load %arg1[%c38] : memref<99xf32, #tpu.memory_space<smem>>
    %311 = vector.extract_strided_slice %12 {offsets = [0, 160], sizes = [1, 256], strides = [1, 1]} : vector<1x435xf32> to vector<1x256xf32>
    %312 = vector.broadcast %310 : f32 to vector<1x256xf32>
    %313 = arith.mulf %312, %311 : vector<1x256xf32>
    %314 = arith.addf %309, %313 : vector<1x256xf32>
    %c87 = arith.constant 87 : index
    %315 = memref.load %arg1[%c87] : memref<99xf32, #tpu.memory_space<smem>>
    %316 = vector.extract_strided_slice %13 {offsets = [0, 160], sizes = [1, 256], strides = [1, 1]} : vector<1x435xf32> to vector<1x256xf32>
    %317 = vector.broadcast %315 : f32 to vector<1x256xf32>
    %318 = arith.mulf %317, %316 : vector<1x256xf32>
    %319 = arith.addf %314, %318 : vector<1x256xf32>
    %c45 = arith.constant 45 : index
    %320 = memref.load %arg1[%c45] : memref<99xf32, #tpu.memory_space<smem>>
    %321 = vector.extract_strided_slice %12 {offsets = [0, 176], sizes = [1, 256], strides = [1, 1]} : vector<1x435xf32> to vector<1x256xf32>
    %322 = vector.broadcast %320 : f32 to vector<1x256xf32>
    %323 = arith.mulf %322, %321 : vector<1x256xf32>
    %324 = arith.addf %319, %323 : vector<1x256xf32>
    %c94 = arith.constant 94 : index
    %325 = memref.load %arg1[%c94] : memref<99xf32, #tpu.memory_space<smem>>
    %326 = vector.extract_strided_slice %13 {offsets = [0, 176], sizes = [1, 256], strides = [1, 1]} : vector<1x435xf32> to vector<1x256xf32>
    %327 = vector.broadcast %325 : f32 to vector<1x256xf32>
    %328 = arith.mulf %327, %326 : vector<1x256xf32>
    %329 = arith.addf %324, %328 : vector<1x256xf32>
    %cst_24 = arith.constant 0.000000e+00 : f32
    %330 = vector.broadcast %cst_24 : f32 to vector<1x256xf32>
    %331 = arith.select %258, %329, %330 : vector<1x256xi1>, vector<1x256xf32>
    %332 = arith.addf %253, %331 : vector<1x256xf32>
    %c-1_i32 = arith.constant -1 : i32
    %333 = vector.broadcast %c-1_i32 : i32 to vector<1x256xi32>
    %334 = arith.cmpi sge, %14, %333 : vector<1x256xi32>
    %c15_i32 = arith.constant 15 : i32
    %335 = vector.broadcast %c15_i32 : i32 to vector<1x256xi32>
    %336 = arith.cmpi slt, %14, %335 : vector<1x256xi32>
    %337 = arith.andi %334, %336 : vector<1x256xi1>
    %cst_25 = arith.constant 0.000000e+00 : f32
    %338 = vector.broadcast %cst_25 : f32 to vector<1x256xf32>
    %c4 = arith.constant 4 : index
    %339 = memref.load %arg1[%c4] : memref<99xf32, #tpu.memory_space<smem>>
    %340 = vector.extract_strided_slice %12 {offsets = [0, 81], sizes = [1, 256], strides = [1, 1]} : vector<1x435xf32> to vector<1x256xf32>
    %341 = vector.broadcast %339 : f32 to vector<1x256xf32>
    %342 = arith.mulf %341, %340 : vector<1x256xf32>
    %343 = arith.addf %338, %342 : vector<1x256xf32>
    %c53 = arith.constant 53 : index
    %344 = memref.load %arg1[%c53] : memref<99xf32, #tpu.memory_space<smem>>
    %345 = vector.extract_strided_slice %13 {offsets = [0, 81], sizes = [1, 256], strides = [1, 1]} : vector<1x435xf32> to vector<1x256xf32>
    %346 = vector.broadcast %344 : f32 to vector<1x256xf32>
    %347 = arith.mulf %346, %345 : vector<1x256xf32>
    %348 = arith.addf %343, %347 : vector<1x256xf32>
    %c11 = arith.constant 11 : index
    %349 = memref.load %arg1[%c11] : memref<99xf32, #tpu.memory_space<smem>>
    %350 = vector.extract_strided_slice %12 {offsets = [0, 97], sizes = [1, 256], strides = [1, 1]} : vector<1x435xf32> to vector<1x256xf32>
    %351 = vector.broadcast %349 : f32 to vector<1x256xf32>
    %352 = arith.mulf %351, %350 : vector<1x256xf32>
    %353 = arith.addf %348, %352 : vector<1x256xf32>
    %c60 = arith.constant 60 : index
    %354 = memref.load %arg1[%c60] : memref<99xf32, #tpu.memory_space<smem>>
    %355 = vector.extract_strided_slice %13 {offsets = [0, 97], sizes = [1, 256], strides = [1, 1]} : vector<1x435xf32> to vector<1x256xf32>
    %356 = vector.broadcast %354 : f32 to vector<1x256xf32>
    %357 = arith.mulf %356, %355 : vector<1x256xf32>
    %358 = arith.addf %353, %357 : vector<1x256xf32>
    %c18 = arith.constant 18 : index
    %359 = memref.load %arg1[%c18] : memref<99xf32, #tpu.memory_space<smem>>
    %360 = vector.extract_strided_slice %12 {offsets = [0, 113], sizes = [1, 256], strides = [1, 1]} : vector<1x435xf32> to vector<1x256xf32>
    %361 = vector.broadcast %359 : f32 to vector<1x256xf32>
    %362 = arith.mulf %361, %360 : vector<1x256xf32>
    %363 = arith.addf %358, %362 : vector<1x256xf32>
    %c67 = arith.constant 67 : index
    %364 = memref.load %arg1[%c67] : memref<99xf32, #tpu.memory_space<smem>>
    %365 = vector.extract_strided_slice %13 {offsets = [0, 113], sizes = [1, 256], strides = [1, 1]} : vector<1x435xf32> to vector<1x256xf32>
    %366 = vector.broadcast %364 : f32 to vector<1x256xf32>
    %367 = arith.mulf %366, %365 : vector<1x256xf32>
    %368 = arith.addf %363, %367 : vector<1x256xf32>
    %c25 = arith.constant 25 : index
    %369 = memref.load %arg1[%c25] : memref<99xf32, #tpu.memory_space<smem>>
    %370 = vector.extract_strided_slice %12 {offsets = [0, 129], sizes = [1, 256], strides = [1, 1]} : vector<1x435xf32> to vector<1x256xf32>
    %371 = vector.broadcast %369 : f32 to vector<1x256xf32>
    %372 = arith.mulf %371, %370 : vector<1x256xf32>
    %373 = arith.addf %368, %372 : vector<1x256xf32>
    %c74 = arith.constant 74 : index
    %374 = memref.load %arg1[%c74] : memref<99xf32, #tpu.memory_space<smem>>
    %375 = vector.extract_strided_slice %13 {offsets = [0, 129], sizes = [1, 256], strides = [1, 1]} : vector<1x435xf32> to vector<1x256xf32>
    %376 = vector.broadcast %374 : f32 to vector<1x256xf32>
    %377 = arith.mulf %376, %375 : vector<1x256xf32>
    %378 = arith.addf %373, %377 : vector<1x256xf32>
    %c32 = arith.constant 32 : index
    %379 = memref.load %arg1[%c32] : memref<99xf32, #tpu.memory_space<smem>>
    %380 = vector.extract_strided_slice %12 {offsets = [0, 145], sizes = [1, 256], strides = [1, 1]} : vector<1x435xf32> to vector<1x256xf32>
    %381 = vector.broadcast %379 : f32 to vector<1x256xf32>
    %382 = arith.mulf %381, %380 : vector<1x256xf32>
    %383 = arith.addf %378, %382 : vector<1x256xf32>
    %c81 = arith.constant 81 : index
    %384 = memref.load %arg1[%c81] : memref<99xf32, #tpu.memory_space<smem>>
    %385 = vector.extract_strided_slice %13 {offsets = [0, 145], sizes = [1, 256], strides = [1, 1]} : vector<1x435xf32> to vector<1x256xf32>
    %386 = vector.broadcast %384 : f32 to vector<1x256xf32>
    %387 = arith.mulf %386, %385 : vector<1x256xf32>
    %388 = arith.addf %383, %387 : vector<1x256xf32>
    %c39 = arith.constant 39 : index
    %389 = memref.load %arg1[%c39] : memref<99xf32, #tpu.memory_space<smem>>
    %390 = vector.extract_strided_slice %12 {offsets = [0, 161], sizes = [1, 256], strides = [1, 1]} : vector<1x435xf32> to vector<1x256xf32>
    %391 = vector.broadcast %389 : f32 to vector<1x256xf32>
    %392 = arith.mulf %391, %390 : vector<1x256xf32>
    %393 = arith.addf %388, %392 : vector<1x256xf32>
    %c88 = arith.constant 88 : index
    %394 = memref.load %arg1[%c88] : memref<99xf32, #tpu.memory_space<smem>>
    %395 = vector.extract_strided_slice %13 {offsets = [0, 161], sizes = [1, 256], strides = [1, 1]} : vector<1x435xf32> to vector<1x256xf32>
    %396 = vector.broadcast %394 : f32 to vector<1x256xf32>
    %397 = arith.mulf %396, %395 : vector<1x256xf32>
    %398 = arith.addf %393, %397 : vector<1x256xf32>
    %c46 = arith.constant 46 : index
    %399 = memref.load %arg1[%c46] : memref<99xf32, #tpu.memory_space<smem>>
    %400 = vector.extract_strided_slice %12 {offsets = [0, 177], sizes = [1, 256], strides = [1, 1]} : vector<1x435xf32> to vector<1x256xf32>
    %401 = vector.broadcast %399 : f32 to vector<1x256xf32>
    %402 = arith.mulf %401, %400 : vector<1x256xf32>
    %403 = arith.addf %398, %402 : vector<1x256xf32>
    %c95 = arith.constant 95 : index
    %404 = memref.load %arg1[%c95] : memref<99xf32, #tpu.memory_space<smem>>
    %405 = vector.extract_strided_slice %13 {offsets = [0, 177], sizes = [1, 256], strides = [1, 1]} : vector<1x435xf32> to vector<1x256xf32>
    %406 = vector.broadcast %404 : f32 to vector<1x256xf32>
    %407 = arith.mulf %406, %405 : vector<1x256xf32>
    %408 = arith.addf %403, %407 : vector<1x256xf32>
    %cst_26 = arith.constant 0.000000e+00 : f32
    %409 = vector.broadcast %cst_26 : f32 to vector<1x256xf32>
    %410 = arith.select %337, %408, %409 : vector<1x256xi1>, vector<1x256xf32>
    %411 = arith.addf %332, %410 : vector<1x256xf32>
    %c-2_i32 = arith.constant -2 : i32
    %412 = vector.broadcast %c-2_i32 : i32 to vector<1x256xi32>
    %413 = arith.cmpi sge, %14, %412 : vector<1x256xi32>
    %c14_i32 = arith.constant 14 : i32
    %414 = vector.broadcast %c14_i32 : i32 to vector<1x256xi32>
    %415 = arith.cmpi slt, %14, %414 : vector<1x256xi32>
    %416 = arith.andi %413, %415 : vector<1x256xi1>
    %cst_27 = arith.constant 0.000000e+00 : f32
    %417 = vector.broadcast %cst_27 : f32 to vector<1x256xf32>
    %c5 = arith.constant 5 : index
    %418 = memref.load %arg1[%c5] : memref<99xf32, #tpu.memory_space<smem>>
    %419 = vector.extract_strided_slice %12 {offsets = [0, 82], sizes = [1, 256], strides = [1, 1]} : vector<1x435xf32> to vector<1x256xf32>
    %420 = vector.broadcast %418 : f32 to vector<1x256xf32>
    %421 = arith.mulf %420, %419 : vector<1x256xf32>
    %422 = arith.addf %417, %421 : vector<1x256xf32>
    %c54 = arith.constant 54 : index
    %423 = memref.load %arg1[%c54] : memref<99xf32, #tpu.memory_space<smem>>
    %424 = vector.extract_strided_slice %13 {offsets = [0, 82], sizes = [1, 256], strides = [1, 1]} : vector<1x435xf32> to vector<1x256xf32>
    %425 = vector.broadcast %423 : f32 to vector<1x256xf32>
    %426 = arith.mulf %425, %424 : vector<1x256xf32>
    %427 = arith.addf %422, %426 : vector<1x256xf32>
    %c12 = arith.constant 12 : index
    %428 = memref.load %arg1[%c12] : memref<99xf32, #tpu.memory_space<smem>>
    %429 = vector.extract_strided_slice %12 {offsets = [0, 98], sizes = [1, 256], strides = [1, 1]} : vector<1x435xf32> to vector<1x256xf32>
    %430 = vector.broadcast %428 : f32 to vector<1x256xf32>
    %431 = arith.mulf %430, %429 : vector<1x256xf32>
    %432 = arith.addf %427, %431 : vector<1x256xf32>
    %c61 = arith.constant 61 : index
    %433 = memref.load %arg1[%c61] : memref<99xf32, #tpu.memory_space<smem>>
    %434 = vector.extract_strided_slice %13 {offsets = [0, 98], sizes = [1, 256], strides = [1, 1]} : vector<1x435xf32> to vector<1x256xf32>
    %435 = vector.broadcast %433 : f32 to vector<1x256xf32>
    %436 = arith.mulf %435, %434 : vector<1x256xf32>
    %437 = arith.addf %432, %436 : vector<1x256xf32>
    %c19 = arith.constant 19 : index
    %438 = memref.load %arg1[%c19] : memref<99xf32, #tpu.memory_space<smem>>
    %439 = vector.extract_strided_slice %12 {offsets = [0, 114], sizes = [1, 256], strides = [1, 1]} : vector<1x435xf32> to vector<1x256xf32>
    %440 = vector.broadcast %438 : f32 to vector<1x256xf32>
    %441 = arith.mulf %440, %439 : vector<1x256xf32>
    %442 = arith.addf %437, %441 : vector<1x256xf32>
    %c68 = arith.constant 68 : index
    %443 = memref.load %arg1[%c68] : memref<99xf32, #tpu.memory_space<smem>>
    %444 = vector.extract_strided_slice %13 {offsets = [0, 114], sizes = [1, 256], strides = [1, 1]} : vector<1x435xf32> to vector<1x256xf32>
    %445 = vector.broadcast %443 : f32 to vector<1x256xf32>
    %446 = arith.mulf %445, %444 : vector<1x256xf32>
    %447 = arith.addf %442, %446 : vector<1x256xf32>
    %c26 = arith.constant 26 : index
    %448 = memref.load %arg1[%c26] : memref<99xf32, #tpu.memory_space<smem>>
    %449 = vector.extract_strided_slice %12 {offsets = [0, 130], sizes = [1, 256], strides = [1, 1]} : vector<1x435xf32> to vector<1x256xf32>
    %450 = vector.broadcast %448 : f32 to vector<1x256xf32>
    %451 = arith.mulf %450, %449 : vector<1x256xf32>
    %452 = arith.addf %447, %451 : vector<1x256xf32>
    %c75 = arith.constant 75 : index
    %453 = memref.load %arg1[%c75] : memref<99xf32, #tpu.memory_space<smem>>
    %454 = vector.extract_strided_slice %13 {offsets = [0, 130], sizes = [1, 256], strides = [1, 1]} : vector<1x435xf32> to vector<1x256xf32>
    %455 = vector.broadcast %453 : f32 to vector<1x256xf32>
    %456 = arith.mulf %455, %454 : vector<1x256xf32>
    %457 = arith.addf %452, %456 : vector<1x256xf32>
    %c33 = arith.constant 33 : index
    %458 = memref.load %arg1[%c33] : memref<99xf32, #tpu.memory_space<smem>>
    %459 = vector.extract_strided_slice %12 {offsets = [0, 146], sizes = [1, 256], strides = [1, 1]} : vector<1x435xf32> to vector<1x256xf32>
    %460 = vector.broadcast %458 : f32 to vector<1x256xf32>
    %461 = arith.mulf %460, %459 : vector<1x256xf32>
    %462 = arith.addf %457, %461 : vector<1x256xf32>
    %c82 = arith.constant 82 : index
    %463 = memref.load %arg1[%c82] : memref<99xf32, #tpu.memory_space<smem>>
    %464 = vector.extract_strided_slice %13 {offsets = [0, 146], sizes = [1, 256], strides = [1, 1]} : vector<1x435xf32> to vector<1x256xf32>
    %465 = vector.broadcast %463 : f32 to vector<1x256xf32>
    %466 = arith.mulf %465, %464 : vector<1x256xf32>
    %467 = arith.addf %462, %466 : vector<1x256xf32>
    %c40 = arith.constant 40 : index
    %468 = memref.load %arg1[%c40] : memref<99xf32, #tpu.memory_space<smem>>
    %469 = vector.extract_strided_slice %12 {offsets = [0, 162], sizes = [1, 256], strides = [1, 1]} : vector<1x435xf32> to vector<1x256xf32>
    %470 = vector.broadcast %468 : f32 to vector<1x256xf32>
    %471 = arith.mulf %470, %469 : vector<1x256xf32>
    %472 = arith.addf %467, %471 : vector<1x256xf32>
    %c89 = arith.constant 89 : index
    %473 = memref.load %arg1[%c89] : memref<99xf32, #tpu.memory_space<smem>>
    %474 = vector.extract_strided_slice %13 {offsets = [0, 162], sizes = [1, 256], strides = [1, 1]} : vector<1x435xf32> to vector<1x256xf32>
    %475 = vector.broadcast %473 : f32 to vector<1x256xf32>
    %476 = arith.mulf %475, %474 : vector<1x256xf32>
    %477 = arith.addf %472, %476 : vector<1x256xf32>
    %c47 = arith.constant 47 : index
    %478 = memref.load %arg1[%c47] : memref<99xf32, #tpu.memory_space<smem>>
    %479 = vector.extract_strided_slice %12 {offsets = [0, 178], sizes = [1, 256], strides = [1, 1]} : vector<1x435xf32> to vector<1x256xf32>
    %480 = vector.broadcast %478 : f32 to vector<1x256xf32>
    %481 = arith.mulf %480, %479 : vector<1x256xf32>
    %482 = arith.addf %477, %481 : vector<1x256xf32>
    %c96 = arith.constant 96 : index
    %483 = memref.load %arg1[%c96] : memref<99xf32, #tpu.memory_space<smem>>
    %484 = vector.extract_strided_slice %13 {offsets = [0, 178], sizes = [1, 256], strides = [1, 1]} : vector<1x435xf32> to vector<1x256xf32>
    %485 = vector.broadcast %483 : f32 to vector<1x256xf32>
    %486 = arith.mulf %485, %484 : vector<1x256xf32>
    %487 = arith.addf %482, %486 : vector<1x256xf32>
    %cst_28 = arith.constant 0.000000e+00 : f32
    %488 = vector.broadcast %cst_28 : f32 to vector<1x256xf32>
    %489 = arith.select %416, %487, %488 : vector<1x256xi1>, vector<1x256xf32>
    %490 = arith.addf %411, %489 : vector<1x256xf32>
    %c-3_i32 = arith.constant -3 : i32
    %491 = vector.broadcast %c-3_i32 : i32 to vector<1x256xi32>
    %492 = arith.cmpi sge, %14, %491 : vector<1x256xi32>
    %c13_i32 = arith.constant 13 : i32
    %493 = vector.broadcast %c13_i32 : i32 to vector<1x256xi32>
    %494 = arith.cmpi slt, %14, %493 : vector<1x256xi32>
    %495 = arith.andi %492, %494 : vector<1x256xi1>
    %cst_29 = arith.constant 0.000000e+00 : f32
    %496 = vector.broadcast %cst_29 : f32 to vector<1x256xf32>
    %c6 = arith.constant 6 : index
    %497 = memref.load %arg1[%c6] : memref<99xf32, #tpu.memory_space<smem>>
    %498 = vector.extract_strided_slice %12 {offsets = [0, 83], sizes = [1, 256], strides = [1, 1]} : vector<1x435xf32> to vector<1x256xf32>
    %499 = vector.broadcast %497 : f32 to vector<1x256xf32>
    %500 = arith.mulf %499, %498 : vector<1x256xf32>
    %501 = arith.addf %496, %500 : vector<1x256xf32>
    %c55 = arith.constant 55 : index
    %502 = memref.load %arg1[%c55] : memref<99xf32, #tpu.memory_space<smem>>
    %503 = vector.extract_strided_slice %13 {offsets = [0, 83], sizes = [1, 256], strides = [1, 1]} : vector<1x435xf32> to vector<1x256xf32>
    %504 = vector.broadcast %502 : f32 to vector<1x256xf32>
    %505 = arith.mulf %504, %503 : vector<1x256xf32>
    %506 = arith.addf %501, %505 : vector<1x256xf32>
    %c13 = arith.constant 13 : index
    %507 = memref.load %arg1[%c13] : memref<99xf32, #tpu.memory_space<smem>>
    %508 = vector.extract_strided_slice %12 {offsets = [0, 99], sizes = [1, 256], strides = [1, 1]} : vector<1x435xf32> to vector<1x256xf32>
    %509 = vector.broadcast %507 : f32 to vector<1x256xf32>
    %510 = arith.mulf %509, %508 : vector<1x256xf32>
    %511 = arith.addf %506, %510 : vector<1x256xf32>
    %c62 = arith.constant 62 : index
    %512 = memref.load %arg1[%c62] : memref<99xf32, #tpu.memory_space<smem>>
    %513 = vector.extract_strided_slice %13 {offsets = [0, 99], sizes = [1, 256], strides = [1, 1]} : vector<1x435xf32> to vector<1x256xf32>
    %514 = vector.broadcast %512 : f32 to vector<1x256xf32>
    %515 = arith.mulf %514, %513 : vector<1x256xf32>
    %516 = arith.addf %511, %515 : vector<1x256xf32>
    %c20 = arith.constant 20 : index
    %517 = memref.load %arg1[%c20] : memref<99xf32, #tpu.memory_space<smem>>
    %518 = vector.extract_strided_slice %12 {offsets = [0, 115], sizes = [1, 256], strides = [1, 1]} : vector<1x435xf32> to vector<1x256xf32>
    %519 = vector.broadcast %517 : f32 to vector<1x256xf32>
    %520 = arith.mulf %519, %518 : vector<1x256xf32>
    %521 = arith.addf %516, %520 : vector<1x256xf32>
    %c69 = arith.constant 69 : index
    %522 = memref.load %arg1[%c69] : memref<99xf32, #tpu.memory_space<smem>>
    %523 = vector.extract_strided_slice %13 {offsets = [0, 115], sizes = [1, 256], strides = [1, 1]} : vector<1x435xf32> to vector<1x256xf32>
    %524 = vector.broadcast %522 : f32 to vector<1x256xf32>
    %525 = arith.mulf %524, %523 : vector<1x256xf32>
    %526 = arith.addf %521, %525 : vector<1x256xf32>
    %c27 = arith.constant 27 : index
    %527 = memref.load %arg1[%c27] : memref<99xf32, #tpu.memory_space<smem>>
    %528 = vector.extract_strided_slice %12 {offsets = [0, 131], sizes = [1, 256], strides = [1, 1]} : vector<1x435xf32> to vector<1x256xf32>
    %529 = vector.broadcast %527 : f32 to vector<1x256xf32>
    %530 = arith.mulf %529, %528 : vector<1x256xf32>
    %531 = arith.addf %526, %530 : vector<1x256xf32>
    %c76 = arith.constant 76 : index
    %532 = memref.load %arg1[%c76] : memref<99xf32, #tpu.memory_space<smem>>
    %533 = vector.extract_strided_slice %13 {offsets = [0, 131], sizes = [1, 256], strides = [1, 1]} : vector<1x435xf32> to vector<1x256xf32>
    %534 = vector.broadcast %532 : f32 to vector<1x256xf32>
    %535 = arith.mulf %534, %533 : vector<1x256xf32>
    %536 = arith.addf %531, %535 : vector<1x256xf32>
    %c34 = arith.constant 34 : index
    %537 = memref.load %arg1[%c34] : memref<99xf32, #tpu.memory_space<smem>>
    %538 = vector.extract_strided_slice %12 {offsets = [0, 147], sizes = [1, 256], strides = [1, 1]} : vector<1x435xf32> to vector<1x256xf32>
    %539 = vector.broadcast %537 : f32 to vector<1x256xf32>
    %540 = arith.mulf %539, %538 : vector<1x256xf32>
    %541 = arith.addf %536, %540 : vector<1x256xf32>
    %c83 = arith.constant 83 : index
    %542 = memref.load %arg1[%c83] : memref<99xf32, #tpu.memory_space<smem>>
    %543 = vector.extract_strided_slice %13 {offsets = [0, 147], sizes = [1, 256], strides = [1, 1]} : vector<1x435xf32> to vector<1x256xf32>
    %544 = vector.broadcast %542 : f32 to vector<1x256xf32>
    %545 = arith.mulf %544, %543 : vector<1x256xf32>
    %546 = arith.addf %541, %545 : vector<1x256xf32>
    %c41 = arith.constant 41 : index
    %547 = memref.load %arg1[%c41] : memref<99xf32, #tpu.memory_space<smem>>
    %548 = vector.extract_strided_slice %12 {offsets = [0, 163], sizes = [1, 256], strides = [1, 1]} : vector<1x435xf32> to vector<1x256xf32>
    %549 = vector.broadcast %547 : f32 to vector<1x256xf32>
    %550 = arith.mulf %549, %548 : vector<1x256xf32>
    %551 = arith.addf %546, %550 : vector<1x256xf32>
    %c90 = arith.constant 90 : index
    %552 = memref.load %arg1[%c90] : memref<99xf32, #tpu.memory_space<smem>>
    %553 = vector.extract_strided_slice %13 {offsets = [0, 163], sizes = [1, 256], strides = [1, 1]} : vector<1x435xf32> to vector<1x256xf32>
    %554 = vector.broadcast %552 : f32 to vector<1x256xf32>
    %555 = arith.mulf %554, %553 : vector<1x256xf32>
    %556 = arith.addf %551, %555 : vector<1x256xf32>
    %c48 = arith.constant 48 : index
    %557 = memref.load %arg1[%c48] : memref<99xf32, #tpu.memory_space<smem>>
    %558 = vector.extract_strided_slice %12 {offsets = [0, 179], sizes = [1, 256], strides = [1, 1]} : vector<1x435xf32> to vector<1x256xf32>
    %559 = vector.broadcast %557 : f32 to vector<1x256xf32>
    %560 = arith.mulf %559, %558 : vector<1x256xf32>
    %561 = arith.addf %556, %560 : vector<1x256xf32>
    %c97 = arith.constant 97 : index
    %562 = memref.load %arg1[%c97] : memref<99xf32, #tpu.memory_space<smem>>
    %563 = vector.extract_strided_slice %13 {offsets = [0, 179], sizes = [1, 256], strides = [1, 1]} : vector<1x435xf32> to vector<1x256xf32>
    %564 = vector.broadcast %562 : f32 to vector<1x256xf32>
    %565 = arith.mulf %564, %563 : vector<1x256xf32>
    %566 = arith.addf %561, %565 : vector<1x256xf32>
    %cst_30 = arith.constant 0.000000e+00 : f32
    %567 = vector.broadcast %cst_30 : f32 to vector<1x256xf32>
    %568 = arith.select %495, %566, %567 : vector<1x256xi1>, vector<1x256xf32>
    %569 = arith.addf %490, %568 : vector<1x256xf32>
    %570 = arith.negf %569 : vector<1x256xf32>
    %571 = math.exp %570 : vector<1x256xf32>
    %cst_31 = arith.constant 1.000000e+00 : f32
    %572 = vector.broadcast %cst_31 : f32 to vector<1x256xf32>
    %573 = arith.addf %572, %571 : vector<1x256xf32>
    %574 = arith.divf %572, %573 : vector<1x256xf32>
    %c0_32 = arith.constant 0 : index
    %c0_33 = arith.constant 0 : index
    %c0_34 = arith.constant 0 : index
    %575 = vector.load %arg3[%c0_32, %c0_33, %c0_34] : memref<1x4x256xf32, #tpu.memory_space<vmem>>, vector<1x4x256xf32>
    %576 = vector.shape_cast %575 : vector<1x4x256xf32> to vector<4x256xf32>
    %577 = vector.broadcast %574 : vector<1x256xf32> to vector<4x256xf32>
    %578 = arith.mulf %576, %577 : vector<4x256xf32>
    %c0_35 = arith.constant 0 : index
    %c0_36 = arith.constant 0 : index
    %c0_37 = arith.constant 0 : index
    %579 = vector.load %arg4[%c0_35, %c0_36, %c0_37] : memref<1x4x256xf32, #tpu.memory_space<vmem>>, vector<1x4x256xf32>
    %580 = vector.shape_cast %579 : vector<1x4x256xf32> to vector<4x256xf32>
    %581 = vector.shape_cast %578 : vector<4x256xf32> to vector<1x4x256xf32>
    tpu.vector_store %arg4[%c0_35, %c0_36, %c0_37], %581 {strides = array<i32>} : memref<1x4x256xf32, #tpu.memory_space<vmem>>, vector<1x4x256xf32>,
    return
  }
  func.func @transform_0(%arg0: i32, %arg1: memref<99xf32, #tpu.memory_space<smem>>) -> (i32, i32) {
    %c0_i32 = arith.constant 0 : i32
    %c0_i32_0 = arith.constant 0 : i32
    %c0_i32_1 = arith.constant 0 : i32
    return %c0_i32, %c0_i32_0 : i32, i32
  }
  func.func @transform_1(%arg0: i32, %arg1: memref<99xf32, #tpu.memory_space<smem>>) -> (i32, i32, i32) {
    %c0_i32 = arith.constant 0 : i32
    %c0_i32_0 = arith.constant 0 : i32
    %c0_i32_1 = arith.constant 0 : i32
    return %arg0, %c0_i32, %c0_i32_0 : i32, i32, i32
  }
  func.func @transform_2(%arg0: i32, %arg1: memref<99xf32, #tpu.memory_space<smem>>) -> (i32, i32, i32) {
    %c0_i32 = arith.constant 0 : i32
    %c0_i32_0 = arith.constant 0 : i32
    %c0_i32_1 = arith.constant 0 : i32
    return %arg0, %c0_i32, %c0_i32_0 : i32, i32, i32
  }
}

</mosaic_0001>

<bundles_post_ra>
// kernel: tpu_custom_call.1
= control target key start
LH: loop header
LB: loop body
LE: loop exit
PB: predicated region body
PF: predicated region fallthrough
CT: control target
= control target key end

     0   :  { %s3193_s0 = inlined_call_operand.hbm [shape: f32[99], index: 0, kind: input, shape index: {}]   ;;  %s3194_s1 = inlined_call_operand.vmem [shape: s32[1,256], index: 1, kind: input, shape index: {}]   ;;  %s3195_s2 = inlined_call_operand.hbm [shape: f32[2,4,256], index: 2, kind: input, shape index: {}]   ;;  %s3196_s3 = inlined_call_operand.hbm [shape: f32[2,4,256], index: 3, kind: output, shape index: {}]  }
   0x1   :  { %3223 = sst [smem:[#allocation21_spill]] %s3195_s2  ;;  %s1864_s14 = scalar_lea.hbm %s3193_s0, 16 }
   0x2   :  { %3224 = sst [smem:[#allocation22_spill]] %s3196_s3  ;;  %p1865_p0 = scmp.ne.s32.totalorder %s3193_s0, %s1864_s14 }
   0x3   :  { %p1868_p1 = scmp.lt.u32.totalorder %s1864_s14, %s3193_s0 }
   0x5   :  { %p1870_p2 = pnand %p1868_p1, %p1865_p0 }
   0x7   :  { %1873 = shalt.err (!%p1870_p2)  }
   0x8   :  { %s1974_s19 = smov [#allocation4]  }
   0x9   :  { %9 = dma.hbm_to_smem %s3193_s0, 16, %s1974_s19, [#allocation3] }
   0xa   :  { %1948 = dma.done.wait [#allocation3], 16 }
   0xb   :  { %1949 = vsyncadd [#allocation3], 4294967280 }
   0xc   :  { %11 = sfence }
   0xd   :  { %12 = vsyncpa [#allocation6], 0 }
   0xe   :  { %14 = vsyncpa [#allocation6 + $0x1], 0 }
   0xf   :  { %15 = vsyncpa [#allocation7], 0 }
  0x10   :  { %17 = vsyncpa [#allocation7 + $0x1], 0  ;;  %s2042_s22 = smov 0   ;;  %s2044_s23 = smov 0  }
  0x11   :  { %s2046_s24 = smov 0   ;;  %s2048_s25 = smov 0  }
  0x12 LB: > { %3225 = sst [smem:[#allocation12_spill]] %s1960_s22  ;;  %s2063_s0 = sadd.s32 4294967295, %s1972_s25   ;;  %s1972_s25 = sphi %s2048_s25, %s3269_s25   ;;  %s1968_s24 = sphi %s2046_s24, %s3272_s24   ;;  %s1964_s23 = sphi %s2044_s23, %s3271_s23   ;;  %s1960_s22 = sphi %s2042_s22, %s3270_s22  }
  0x13   : > { %3226 = sst [smem:[#allocation13_spill]] %s1964_s23  ;;  %s1662_s26 = sadd.s32 4294967294, %s1972_s25  }
  0x14   : > { %3227 = sst [smem:[#allocation14_spill]] %s1968_s24  ;;  %s2067_s27 = sadd.s32 1, %s1972_s25  }
  0x15   : > { %3228 = sst [smem:[#allocation15_spill]] %s1972_s25  ;;  %s51_s28 = sadd.s32 1, %s1968_s24 }
  0x16   : > { %3229 = sst [smem:[#allocation16_spill]] %s2067_s27  ;;  %s48_s29 = ssub.s32 %s1972_s25, %s2067_s27 }
  0x17   : > { %p58_p3 = scmp.ne.s32.totalorder %s1968_s24, %s1964_s23  ;;  %p49_p4 = scmp.eq.s32.totalorder %s48_s29, 0 }
  0x18   : > { %p59_p5 = scmp.eq.s32.totalorder %s1972_s25, 0  ;;  %p64_p6 = scmp.ne.s32.totalorder %s1964_s23, %s1960_s22 }
  0x19   : > { %p65_p7 = scmp.eq.s32.totalorder %s2063_s0, 0  ;;  %p88_p10 = scmp.eq.s32.totalorder %s2063_s0, 1 }
  0x1a   : > { %s2079_s30 = scalar_select %p49_p4, %s1968_s24, %s51_s28  }
  0x1b   : > { %p2081_p8 = por %p59_p5, %p58_p3  ;;  %p2085_p9 = por %p65_p7, %p64_p6 }
  0x1c   : > { %3230 = sst [smem:[#allocation17_spill]] %s2079_s30  ;;  %p94_p11 = scmp.eq.s32.totalorder %s1662_s26, 1 }
  0x1d   : > { %p1789_p13 = scmp.lt.s32.totalorder %s1972_s25, 2  ;;  %p2092_p0 = por %p88_p10, %p58_p3 }
  0x1e   : > { %p2096_p1 = por %p94_p11, %p64_p6  ;;  %s117_s8 = sand.u32 1, %s1968_s24  }
  0x1f   : > { %s3233_s6 = scalar_select %p2092_p0, 1, 0 }
  0x20   : > { %s3235_s7 = scalar_select %p2096_p1, 1, 0 }
  0x21   : > { %3234 = sst [smem:[#allocation18_spill]] %s3233_s6  ;;  %s1775_s9 = sshll.u32 %s1972_s25, 7 }
  0x22   : > { %3236 = sst [smem:[#allocation19_spill]] %s3235_s7  ;;  %s1665_s10 = sshll.u32 %s117_s8, 3 }
  0x23   : > { %s3237_s2 = sld [smem:[#allocation21_spill]]  ;;  %s121_s14 = scalar_lea.vmem [#allocation5], %s1665_s10 }
  0x24   : > { %s129_s15 = sshll.u32 %s121_s14, 4  ;;  %p2109_p2 = pnand %p1789_p13, %p2081_p8  ;;  %s2113_s15 = int_to_ptr.vmem [resolvable:$true] %s129_s15 }
  0x25   : > { %s118_s17 = scalar_lea.sflag [#allocation6], %s117_s8 }
  0x26   : > { %p1876_p6 = pneg %p2109_p2 }
  0x29   : > { %s2105_s13 = scalar_lea.hbm %s3237_s2, %s1775_s9  ;;  %s1879_s21 = scalar_lea.hbm %s3237_s2, 256 }
  0x2a   : > { %s1874_s18 = scalar_lea.hbm %s2105_s13, 128  ;;  %p1880_p8 = scmp.lt.u32.totalorder %s2105_s13, %s3237_s2 }
  0x2b   : > { %p1875_p5 = scmp.ne.s32.totalorder %s2105_s13, %s1874_s18  ;;  %p1881_p11 = scmp.lt.u32.totalorder %s1879_s21, %s1874_s18 }
  0x2c   : > { %p1883_p12 = scmp.lt.u32.totalorder %s1874_s18, %s2105_s13 }
  0x2d   : > { %p1877_p7 = pnand %p1876_p6, %p1875_p5  ;;  %p1882_p13 = por %p1881_p11, %p1880_p8 }
  0x2f   : > { %p1878_p10 = pneg %p1877_p7  ;;  %p1884_p3 = por %p1883_p12, %p1882_p13 }
  0x31   : > { %p1885_p4 = pnand %p1884_p3, %p1878_p10 }
  0x33   : > { %1888 = shalt.err (!%p1885_p4)
}
  0x34   : > { %s1889_s29 = scalar_lea.vmem %s2113_s15, 128  ;;  %s1975_s4 = smov [#allocation5]  }
  0x35   : > { %p1890_p5 = scmp.ne.s32.totalorder %s2113_s15, %s1889_s29  ;;  %s1894_s8 = sshll.u32 %s1975_s4, 4  ;;  %s1895_s8 = int_to_ptr.vmem [resolvable:$false] %s1894_s8 }
  0x36   : > { %s1896_s9 = scalar_lea.vmem %s1895_s8, 256  ;;  %p1897_p0 = scmp.lt.s32.totalorder %s2113_s15, %s1895_s8 }
  0x37   : > { %p1892_p7 = pnand %p1890_p5, %p1876_p6  ;;  %p1898_p8 = scmp.lt.s32.totalorder %s1896_s9, %s1889_s29 }
  0x39   : > { %p1893_p1 = pneg %p1892_p7  ;;  %p1899_p11 = por %p1898_p8, %p1897_p0 }
  0x3b   : > { %p1900_p12 = pnand %p1899_p11, %p1893_p1 }
  0x3d   : > { %1903 = shalt.err (!%p1900_p12)
}
  0x3e   : > { %1784 = dma.hbm_to_vmem [thread:$0]  (!%p2109_p2), %s2105_s13, 128, %s2113_s15, %s118_s17  }
  0x3f   : > { %p3239_p3 = scmp.lt.s32.totalorder %s1972_s25, 3  ;;  %p3240_p4 = scmp.ge.s32.totalorder %s1972_s25, 1 }
  0x41   : > { %p135_p6 = pnand %p3240_p4, %p3239_p3 }
  0x43   : > { %138 = sbr.rel (%p135_p6) target bundleno = 657 (0x291), region = 28 }
  0x4a   : > { %s2147_s10 = sand.u32 1, %s1964_s23  }
  0x4b   : > { %3241 = sst [smem:[#allocation20_spill]] %s2147_s10  ;;  %s3198_s11 = sshll.u32 %s2147_s10, 3 }
  0x4c   : > { %s141_s12 = scalar_lea.sflag [#allocation6], %s2147_s10  ;;  %s2153_s14 = scalar_lea.vmem [#allocation5], %s3198_s11 }
  0x4d   : > { %1951 = dma.done.wait (%p2085_p9), %s141_s12, 128  }
  0x4e   : > { %1953 = vsyncadd (%p2085_p9), %s141_s12, 4294967168  ;;  %vm201_vm0 = vcmask 1041408   ;;  %vm202_vm1 = vcmask 1043458   ;;  %vm204_vm2 = vcmask 1045508   ;;  %vm206_vm4 = vcmask 416774   ;;  %v165_v1 = vld [vmem:[%s2153_s14] sm:$0xff] }
  0x4f   : > { %vm203_vm3 = vmor %vm202_vm1, %vm201_vm0  ;;  %v1976_v0 = vmov 0.0   ;;  %vm169_vm7 = vcmask 1043456   ;;  %v167_v2 = vcombine.high %v165_v1, %v165_v1  ;;  %v215_v12 = vlaneseq  ;;  %s1676_s5 = sld [smem:[#allocation4 + $0x3f]]  ;;  %s1678_s13 = sld [smem:[#allocation4 + $0x46]] }
  0x50   : > { %vm205_vm5 = vmor %vm204_vm2, %vm203_vm3  ;;  %v187_v3 = vsel %vm169_vm7, %v165_v1, -inf  ;;  %v170_v4 = vsel %vm169_vm7, %v165_v1, 0.0  ;;  %v1977_v16 = vmov 1966171168   ;;  %s1674_s15 = sld [smem:[#allocation4 + $0x38]]  ;;  %s1978_s16 = smov 114  }
  0x51   : > { %vm207_vm6 = vmor %vm206_vm4, %vm205_vm5  ;;  %v188_v5 = vrot.slane %v187_v3, 4  ;;  %v171_v6 = vrot.slane %v170_v4, 4  ;;  %v194_v7 = vsel %vm169_vm7, %v167_v2, -inf  ;;  %v177_v8 = vsel %vm169_vm7, %v167_v2, 0.0  ;;  %s1979_s17 = smov 115   ;;  %s1675_s18 = sld [smem:[#allocation4 + $0xe]] }
  0x52   : > { %208 = vst.msk [vmem:[#allocation2] sm:$0xff] %vm207_vm6, %v1976_v0  ;;  %v195_v10 = vrot.slane %v194_v7, 4  ;;  %v178_v13 = vrot.slane %v177_v8, 4  ;;  %v213_v17 = vunpack.c.l.s4 %v1977_v16  ;;  %v2160_v23 = vshrl.u32 %v215_v12, 7  ;;  %s1980_s19 = smov 99   ;;  %s1981_s20 = smov 96  }
  0x53   : > { %v189_v9 = vmax.f32 %v187_v3, %v188_v5  ;;  %v172_v11 = vadd.f32 %v171_v6, %v170_v4  ;;  %vm229_vm8 = vcmp.lt.s32.totalorder %v215_v12, 256  ;;  %s3199_s21 = smov 83   ;;  %s3205_s26 = smov 80   ;;  %vm340_vm9 = vcmask 941056  }
  0x54   : > { %v196_v15 = vmax.f32 %v194_v7, %v195_v10  ;;  %v179_v19 = vadd.f32 %v178_v13, %v177_v8  ;;  %v214_v27 = vunpack.c.0.s8 %v213_v17  ;;  %s1984_s28 = smov 112   ;;  %s1985_s29 = smov 127   ;;  %vm375_vm10 = vcmask 809984  }
  0x55   : > { %v190_v14 = vrot.slane %v189_v9, 2  ;;  %v173_v18 = vrot.slane %v172_v11, 2  ;;  %v303_v45 = vstv %s1676_s5  ;;  %v324_v48 = vstv %s1678_s13  ;;  %s1986_s4 = smov 113   ;;  %s1673_s8 = sld [smem:[#allocation4 + $0x7]] }
  0x56   : > { %v197_v21 = vrot.slane %v196_v15, 2  ;;  %v180_v24 = vrot.slane %v179_v19, 2  ;;  %v217_v35 = vsub.s32 %v214_v27, %v2160_v23  ;;  %v282_v50 = vstv %s1674_s15  ;;  %s1677_s9 = sld [smem:[#allocation4 + $0x15]]  ;;  %s1987_s12 = smov 98  }
  0x57   : > { %v191_v20 = vmax.f32 %v189_v9, %v190_v14  ;;  %v174_v22 = vadd.f32 %v173_v18, %v172_v11  ;;  %v292_v53 = vstv %s1675_s18  ;;  %s1988_s5 = smov 126   ;;  %s3209_s13 = smov 82   ;;  %vm408_vm11 = vcmask 678912  }
  0x58   : > { %v198_v26 = vmax.f32 %v196_v15, %v197_v21  ;;  %v181_v29 = vadd.f32 %v180_v24, %v179_v19  ;;  %s1990_s15 = smov 110   ;;  %s3207_s18 = smov 81   ;;  %vm521_vm12 = vcmask 932864   ;;  %vm701_vm13 = vcmask 924672  }
  0x59   : > { %v192_v25 = vrot.slane %v191_v20, 1  ;;  %v175_v28 = vrot.slane %v174_v22, 1  ;;  %s1687_s11 = sld [smem:[#allocation4 + $0x8]]  ;;  %vm1041_vm14 = vcmask 1039360   ;;  %vm555_vm15 = vcmask 801792   ;;  %s2612_s2 = sld [smem:[#allocation4 + $0x3]] }
  0x5a   : > { %v199_v31 = vrot.slane %v198_v26, 1  ;;  %v182_v33 = vrot.slane %v181_v29, 1  ;;  %vm277_vm0 = vcmask 916480   ;;  %vm1232_vm1 = vcmask 1031168   ;;  %s2614_s30 = sld [smem:[#allocation4 + $0x34]]  ;;  %s2642_s24 = sld [smem:[#allocation4 + $0x2d]] }
  0x5b   : > { %v193_v30 = vmax.f32 %v191_v20, %v192_v25  ;;  %v176_v32 = vadd.f32 %v175_v28, %v174_v22  ;;  %v271_v55 = vstv %s1673_s8  ;;  %s3203_s8 = smov 79   ;;  %vm735_vm2 = vcmask 793600   ;;  %s2652_s23 = sld [smem:[#allocation4 + $0x28]] }
  0x5c   : > { %v200_v34 = vmax.f32 %v198_v26, %v199_v31  ;;  %v183_v36 = vadd.f32 %v182_v33, %v181_v29  ;;  %v313_v57 = vstv %s1677_s9  ;;  %s1998_s9 = smov 93   ;;  %vm1074_vm3 = vcmask 908288   ;;  %s3244_s27 = smov 80  }
  0x5d   : > { %v185_v37 = vmul.f32 0.25, %v176_v32  ;;  %vm588_vm4 = vcmask 670720   ;;  %vm1423_vm5 = vcmask 1022976   ;;  %vm298_vm6 = vcmask 785408   ;;  %s3245_s25 = smov 79   ;;  %s2667_s7 = sld [smem:[#allocation4 + $0x4]] }
  0x5e   : > { %v235_v38 = vcombine.low %v193_v30, %v200_v34  ;;  %v186_v39 = vmul.f32 0.25, %v183_v36  ;;  %vm1265_vm7 = vcmask 900096   ;;  %s2669_s22 = sld [smem:[#allocation4 + $0x35]]  ;;  %s2675_s3 = sld [smem:[#allocation4 + $0x1]] }
  0x5f   : > { %v456_v8 = vstv %s1687_s11  ;;  %s2271_s11 = sld [smem:[#allocation4 + $0x3b]]  ;;  %s2677_s6 = sld [smem:[#allocation4 + $0x32]] }
  0x60   : > { %v242_v40 = vrot.slane %v235_v38, %v217_v35  ;;  %v211_v41 = vcombine.low %v185_v37, %v186_v39  ;;  %s2708_s10 = sld [smem:[#allocation4 + $0x33]] }
  0x62   : > { %v249_v42 = vrot.slane %v242_v40, %v217_v35  ;;  %v218_v43 = vrot.slane %v211_v41, %v217_v35 }
  0x64   : > { %252 = vst.msk [vmem:[#allocation2 + $0x3] ss:$2 sm:$0x3] %vm229_vm8, %v249_v42  ;;  %v225_v44 = vrot.slane %v218_v43, %v217_v35 }
  0x65   : > { %v826_v34 = vstv %s2271_s11  ;;  %s2318_s11 = sld [smem:[#allocation4 + $0x17]] }
  0x66   : > { %232 = vst.msk [vmem:[#allocation2 + $0x2] ss:$2 sm:$0x3] %vm229_vm8, %v225_v44  ;;  %vm768_vm8 = vcmask 662528  }
  0x6b   : > { %v2163_v46 = vld [vmem:[#allocation2 + $0x1] ss:$2 sm:$0xf] }
  0x6c   : > { %535 = vrot.lane.b32.xlu1 %v2163_v46, %s1978_s16  ;;  %355 = vrot.lane.b32.xlu0 %v2163_v46, %s1979_s17  ;;  %v304_v47 = vmul.f32 %v303_v45, %v2163_v46  ;;  %v325_v49 = vmul.f32 %v324_v48, %v2163_v46  ;;  %v283_v51 = vmul.f32 %v282_v50, %v2163_v46 }
  0x6d   : > { %v2176_v52 = vld [vmem:[#allocation2] ss:$2 sm:$0xf]  ;;  %v827_v41 = vmul.f32 %v826_v34, %v2163_v46 }
  0x6e   : > { %v293_v54 = vmul.f32 %v292_v53, %v2176_v52  ;;  %v272_v56 = vmul.f32 %v271_v55, %v2176_v52  ;;  %v314_v58 = vmul.f32 %v313_v57, %v2176_v52  ;;  %v457_v12 = vmul.f32 %v456_v8, %v2176_v52 }
  0x70   : > { %388 = vrot.lane.b32.xlu0 %v2163_v46, %s1980_s19  ;;  %306 = vrot.lane.b32.xlu1 %v304_v47, %s1981_s20 }
  0x74   : > { %421 = vrot.lane.b32.xlu0 %v2163_v46, %s3199_s21  ;;  %327 = vrot.lane.b32.xlu1 %v325_v49, %s3205_s26 }
  0x78   : > { %285 = vrot.lane.b32.xlu0 %v283_v51, %s1984_s28  ;;  %1037 = vrot.lane.b32.xlu1 %v2176_v52, %s1985_s29 }
  0x7c   : > { %336 = vrot.lane.b32.xlu0 %v2176_v52, %s1979_s17  ;;  %295 = vrot.lane.b32.xlu1 %v293_v54, %s1981_s20  ;;  %s1992_s17 = smov 111  }
  0x80   : > { %371 = vrot.lane.b32.xlu0 %v2176_v52, %s1980_s19  ;;  %715 = vrot.lane.b32.xlu1 %v2163_v46, %s1986_s4  ;;  %s1994_s19 = smov 125  }
  0x84   : > { %404 = vrot.lane.b32.xlu0 %v2176_v52, %s3199_s21  ;;  %1054 = vrot.lane.b32.xlu1 %v2163_v46, %s1985_s29  ;;  %s1995_s29 = smov 95   ;;  %s2583_s21 = sld [smem:[#allocation4 + $0x51]] }
  0x88   : > { %517 = vrot.lane.b32.xlu0 %v2176_v52, %s1978_s16  ;;  %568 = vrot.lane.b32.xlu1 %v2163_v46, %s1987_s12  ;;  %s1991_s16 = smov 97  }
  0x8c   : > { %697 = vrot.lane.b32.xlu0 %v2176_v52, %s1986_s4  ;;  %897 = vrot.lane.b32.xlu1 %v2163_v46, %s1984_s28  ;;  %s1996_s4 = smov 109  }
  0x90   : > { %1245 = vrot.lane.b32.xlu1 %v2163_v46, %s1988_s5  ;;  %274 = vrot.lane.b32.xlu0 %v272_v56, %s1984_s28 }
  0x94   : > { %584 = vrot.lane.b32.xlu1 %v2176_v52, %s3209_s13  ;;  %316 = vrot.lane.b32.xlu0 %v314_v58, %s3205_s26 }
  0x98   : > { %913 = vrot.lane.b32.xlu1 %v2176_v52, %s1981_s20  ;;  %551 = vrot.lane.b32.xlu0 %v2176_v52, %s1987_s12  ;;  %s1688_s12 = sld [smem:[#allocation4 + $0x39]] }
  0x9c   : > { %1261 = vrot.lane.b32.xlu1 %v2176_v52, %s1990_s15  ;;  %881 = vrot.lane.b32.xlu0 %v2176_v52, %s1984_s28 }
  0x9e   : > { %v466_v59 = vstv %s1688_s12  ;;  %s1704_s12 = sld [smem:[#allocation4 + $0x41]] }
  0x9f   : > { %v467_v60 = vmul.f32 %v466_v59, %v2163_v46 }
  0xa0   : > { %601 = vrot.lane.b32.xlu1 %v2163_v46, %s3209_s13  ;;  %1228 = vrot.lane.b32.xlu0 %v2176_v52, %s1988_s5  ;;  %s3201_s5 = smov 78  }
  0xa4   : > { %929 = vrot.lane.b32.xlu1 %v2163_v46, %s1981_s20  ;;  %731 = vrot.lane.b32.xlu0 %v2176_v52, %s1991_s16  ;;  %v666_v5 = vstv %s1704_s12  ;;  %s1690_s12 = sld [smem:[#allocation4 + $0x40]] }
  0xa5   : > { %v667_v6 = vmul.f32 %v666_v5, %v2163_v46 }
  0xa8   : > { %1278 = vrot.lane.b32.xlu1 %v2163_v46, %s1990_s15  ;;  %1070 = vrot.lane.b32.xlu0 %v2176_v52, %s1992_s17  ;;  %s1689_s15 = sld [smem:[#allocation4 + $0xf]] }
  0xaa   : > { %v486_v27 = vstv %s1690_s12  ;;  %s2312_s12 = sld [smem:[#allocation4 + $0x1c]] }
  0xab   : > { %v487_v33 = vmul.f32 %v486_v27, %v2163_v46 }
  0xac   : > { %781 = vrot.lane.b32.xlu1 %v2163_v46, %s3207_s18  ;;  %1419 = vrot.lane.b32.xlu0 %v2176_v52, %s1994_s19 }
  0xae   : > { %v476_v61 = vstv %s1689_s15  ;;  %s1730_s15 = sld [smem:[#allocation4 + $0x3c]] }
  0xaf   : > { %v477_v62 = vmul.f32 %v476_v61, %v2176_v52 }
  0xb0   : > { %1120 = vrot.lane.b32.xlu1 %v2163_v46, %s1995_s29  ;;  %748 = vrot.lane.b32.xlu0 %v2163_v46, %s1991_s16  ;;  %s1715_s16 = sld [smem:[#allocation4 + $0xa]] }
  0xb4   : > { %1469 = vrot.lane.b32.xlu1 %v2163_v46, %s1996_s4  ;;  %1087 = vrot.lane.b32.xlu0 %v2163_v46, %s1992_s17  ;;  %s2000_s17 = smov 77   ;;  %v1006_v7 = vstv %s1730_s15  ;;  %s2275_s15 = sld [smem:[#allocation4 + $0x4d]] }
  0xb5   : > { %v1007_v11 = vmul.f32 %v1006_v7, %v2163_v46  ;;  %v676_v7 = vstv %s2318_s11  ;;  %s2370_s11 = sld [smem:[#allocation4 + $0x13]] }
  0xb6   : > { %v816_v63 = vstv %s1715_s16  ;;  %s1692_s16 = sld [smem:[#allocation4 + $0x47]] }
  0xb7   : > { %v817_v0 = vmul.f32 %v816_v63, %v2176_v52 }
  0xb8   : > { %1136 = vrot.lane.b32.xlu1 %v2176_v52, %s3203_s8  ;;  %1436 = vrot.lane.b32.xlu0 %v2163_v46, %s1994_s19  ;;  %s1703_s19 = sld [smem:[#allocation4 + $0x10]] }
  0xba   : > { %v353_v39 = vstv %s2275_s15  ;;  %s2324_s15 = sld [smem:[#allocation4 + $0x23]] }
  0xbc   : > { %1485 = vrot.lane.b32.xlu1 %v2176_v52, %s1998_s9  ;;  %764 = vrot.lane.b32.xlu0 %v2176_v52, %s3207_s18  ;;  %v506_v13 = vstv %s1692_s16  ;;  %s2281_s16 = sld [smem:[#allocation4 + $0x16]] }
  0xbd   : > { %v507_v17 = vmul.f32 %v506_v13, %v2163_v46 }
  0xbe   : > { %v656_v1 = vstv %s1703_s19  ;;  %s1701_s19 = sld [smem:[#allocation4 + $0x9]] }
  0xbf   : > { %v657_v2 = vmul.f32 %v656_v1, %v2176_v52 }
  0xc0   : > { %1327 = vrot.lane.b32.xlu1 %v2176_v52, %s3201_s5  ;;  %1103 = vrot.lane.b32.xlu0 %v2176_v52, %s1995_s29  ;;  %s2001_s29 = smov 94  }
  0xc2   : > { %v496_v42 = vstv %s2281_s16  ;;  %s2330_s16 = sld [smem:[#allocation4 + $0x12]] }
  0xc3   : > { %v497_v51 = vmul.f32 %v496_v42, %v2176_v52 }
  0xc4   : > { %1343 = vrot.lane.b32.xlu1 %v2163_v46, %s3201_s5  ;;  %1452 = vrot.lane.b32.xlu0 %v2176_v52, %s1996_s4  ;;  %s1729_s4 = sld [smem:[#allocation4 + $0xb]]  ;;  %v636_v14 = vstv %s1701_s19  ;;  %s2287_s19 = sld [smem:[#allocation4 + $0x54]] }
  0xc5   : > { %v637_v18 = vmul.f32 %v636_v14, %v2176_v52  ;;  %v370_v14 = vstv %s2324_s15  ;;  %s2372_s15 = sld [smem:[#allocation4 + $0x43]] }
  0xc8   : > { %1534 = vrot.lane.b32.xlu1 %v2163_v46, %s2000_s17  ;;  %945 = vrot.lane.b32.xlu0 %v2176_v52, %s3205_s26 }
  0xca   : > { %v996_v3 = vstv %s1729_s4  ;;  %s1702_s4 = sld [smem:[#allocation4 + $0x3a]]  ;;  %v387_v49 = vstv %s2287_s19 }
  0xcb   : > { %v997_v4 = vmul.f32 %v996_v3, %v2176_v52  ;;  %s2336_s19 = sld [smem:[#allocation4 + $0x2a]] }
  0xcc   : > { %469 = vrot.lane.b32.xlu1 %v467_v60, %s1984_s28  ;;  %1294 = vrot.lane.b32.xlu0 %v2176_v52, %s2001_s29 }
  0xd0   : > { %479 = vrot.lane.b32.xlu1 %v477_v62, %s1981_s20  ;;  %961 = vrot.lane.b32.xlu0 %v2163_v46, %s3205_s26  ;;  %v646_v20 = vstv %s1702_s4  ;;  %s2300_s4 = sld [smem:[#allocation4 + $0x5b]] }
  0xd1   : > { %v647_v25 = vmul.f32 %v646_v20, %v2163_v46 }
  0xd4   : > { %819 = vrot.lane.b32.xlu1 %v817_v0, %s1984_s28  ;;  %1311 = vrot.lane.b32.xlu0 %v2163_v46, %s2001_s29  ;;  %s1718_s29 = sld [smem:[#allocation4 + $0x42]] }
  0xd6   : > { %v420_v59 = vstv %s2300_s4  ;;  %s2350_s4 = sld [smem:[#allocation4 + $0x1d]] }
  0xd8   : > { %659 = vrot.lane.b32.xlu1 %v657_v2, %s1981_s20  ;;  %1152 = vrot.lane.b32.xlu0 %v2163_v46, %s3203_s8 }
  0xda   : > { %v846_v19 = vstv %s1718_s29  ;;  %s2294_s29 = sld [smem:[#allocation4 + $0x11]] }
  0xdb   : > { %v847_v24 = vmul.f32 %v846_v19, %v2163_v46 }
  0xdc   : > { %999 = vrot.lane.b32.xlu1 %v997_v4, %s1984_s28  ;;  %1502 = vrot.lane.b32.xlu0 %v2163_v46, %s1998_s9  ;;  %s1744_s9 = sld [smem:[#allocation4 + $0x3d]]  ;;  %v334_v4 = vstv %s2312_s12  ;;  %s2358_s12 = sld [smem:[#allocation4 + $0x48]] }
  0xde   : > { %v2258_v9 = vpop.permute.xlu1 %535  ;;  %v356_v10 = vpop.permute.xlu0 %355 }
  0xdf   : > { %v357_v30 = vrot.slane %v356_v10, 1  ;;  %v358_v31 = vrot.slane %v356_v10, 2 }
  0xe0   : > { %669 = vrot.lane.b32.xlu1 %v667_v6, %s1981_s20  ;;  %1518 = vrot.lane.b32.xlu0 %v2176_v52, %s2000_s17  ;;  %v836_v53 = vstv %s2294_s29  ;;  %s2342_s29 = sld [smem:[#allocation4 + $0xd]] }
  0xe1   : > { %v359_v40 = vsel %vm340_vm9, %v357_v30, %v358_v31  ;;  %v837_v61 = vmul.f32 %v836_v53, %v2176_v52 }
  0xe2   : > { %v389_v15 = vpop.permute.xlu0 %388  ;;  %v2265_v16 = vpop.permute.xlu1 %306  ;;  %v1197_v26 = vstv %s1744_s9  ;;  %s2306_s9 = sld [smem:[#allocation4 + $0xc]]  ;;  %v361_v45 = vmul.f32 %v359_v40, %v353_v39  ;;  %v857_v39 = vrot.slane %v2176_v52, 1 }
  0xe3   : > { %v1198_v32 = vmul.f32 %v1197_v26, %v2163_v46  ;;  %v390_v37 = vrot.slane %v389_v15, 1  ;;  %v391_v38 = vrot.slane %v389_v15, 2  ;;  %v403_v26 = vstv %s2336_s19  ;;  %s2392_s19 = sld [smem:[#allocation4 + $0x4e]] }
  0xe4   : > { %1009 = vrot.lane.b32.xlu1 %v1007_v11, %s1984_s28  ;;  %459 = vrot.lane.b32.xlu0 %v457_v12, %s1984_s28 }
  0xe5   : > { %v392_v50 = vsel %vm375_vm10, %v390_v37, %v391_v38 }
  0xe6   : > { %v422_v21 = vpop.permute.xlu0 %421  ;;  %v2273_v22 = vpop.permute.xlu1 %327  ;;  %v394_v56 = vmul.f32 %v392_v50, %v387_v49  ;;  %v1378_v31 = vstv %s2342_s29  ;;  %v1207_v49 = vstv %s2370_s11  ;;  %v1026_v50 = vstv %s2372_s15  ;;  %s2407_s29 = sld [smem:[#allocation4 + $0x1e]]  ;;  %s2441_s11 = sld [smem:[#allocation4 + $0x24]] }
  0xe7   : > { %v423_v47 = vrot.slane %v422_v21, 1  ;;  %v424_v48 = vrot.slane %v422_v21, 2  ;;  %v1379_v38 = vmul.f32 %v1378_v31, %v2176_v52  ;;  %s2446_s15 = sld [smem:[#allocation4 + $0x4f]] }
  0xe8   : > { %509 = vrot.lane.b32.xlu1 %v507_v17, %s3205_s26  ;;  %639 = vrot.lane.b32.xlu0 %v637_v18, %s1984_s28  ;;  %v1187_v62 = vstv %s2306_s9  ;;  %v677_v17 = vmul.f32 %v676_v7, %v2176_v52  ;;  %v1016_v18 = vstv %s2330_s16  ;;  %s2356_s9 = sld [smem:[#allocation4 + $0x18]]  ;;  %s2386_s16 = sld [smem:[#allocation4 + $0x3e]] }
  0xe9   : > { %v425_v60 = vsel %vm408_vm11, %v423_v47, %v424_v48  ;;  %v1188_v6 = vmul.f32 %v1187_v62, %v2176_v52  ;;  %v1017_v30 = vmul.f32 %v1016_v18, %v2176_v52 }
  0xea   : > { %v2283_v28 = vpop.permute.xlu0 %285  ;;  %v2285_v29 = vpop.permute.xlu1 %1037  ;;  %v427_v1 = vmul.f32 %v425_v60, %v420_v59 }
  0xec   : > { %849 = vrot.lane.b32.xlu1 %v847_v24, %s1981_s20  ;;  %649 = vrot.lane.b32.xlu0 %v647_v25, %s1984_s28 }
  0xee   : > { %v337_v35 = vpop.permute.xlu0 %336  ;;  %v2296_v36 = vpop.permute.xlu1 %295  ;;  %v856_v40 = vstv %s2356_s9  ;;  %v1388_v59 = vstv %s2386_s16  ;;  %s2424_s9 = sld [smem:[#allocation4 + $0x19]]  ;;  %s2452_s16 = sld [smem:[#allocation4 + $0x1f]] }
  0xef   : > { %v338_v57 = vrot.slane %v337_v35, 1  ;;  %v339_v58 = vrot.slane %v337_v35, 2  ;;  %v516_v35 = vstv %s2350_s4  ;;  %v859_v47 = vmul.f32 %v857_v39, %v856_v40  ;;  %s2414_s4 = sld [smem:[#allocation4 + $0x44]] }
  0xf0   : > { %1200 = vrot.lane.b32.xlu1 %v1198_v32, %s1984_s28  ;;  %489 = vrot.lane.b32.xlu0 %v487_v33, %s1981_s20 }
  0xf1   : > { %v341_v5 = vsel %vm340_vm9, %v338_v57, %v339_v58  ;;  %v1208_v57 = vmul.f32 %v1207_v49, %v2176_v52  ;;  %v1027_v58 = vmul.f32 %v1026_v50, %v2163_v46  ;;  %vm1107_vm9 = vcmask 777216  }
  0xf2   : > { %v372_v43 = vpop.permute.xlu0 %371  ;;  %v2308_v44 = vpop.permute.xlu1 %715  ;;  %v343_v11 = vmul.f32 %v341_v5, %v334_v4 }
  0xf3   : > { %v373_v2 = vrot.slane %v372_v43, 1  ;;  %v374_v3 = vrot.slane %v372_v43, 2  ;;  %v717_v31 = vrot.slane %v2308_v44, 1 }
  0xf4   : > { %363 = vrot.lane.b32.xlu1 %v361_v45, %s2000_s17  ;;  %829 = vrot.lane.b32.xlu0 %v827_v41, %s1984_s28  ;;  %v686_v41 = vstv %s2358_s12  ;;  %s2431_s12 = sld [smem:[#allocation4 + $0x14]] }
  0xf5   : > { %v376_v15 = vsel %vm375_vm10, %v373_v2, %v374_v3  ;;  %v687_v48 = vmul.f32 %v686_v41, %v2163_v46  ;;  %v1389_v2 = vmul.f32 %v1388_v59, %v2163_v46  ;;  %v869_v3 = vrot.slane %v2163_v46, 1 }
  0xf6   : > { %v405_v54 = vpop.permute.xlu0 %404  ;;  %v2320_v55 = vpop.permute.xlu1 %1054  ;;  %v378_v21 = vmul.f32 %v376_v15, %v370_v14  ;;  %v1217_v15 = vstv %s2414_s4  ;;  %v550_v41 = vstv %s2441_s11  ;;  %s2498_s4 = sld [smem:[#allocation4 + $0x50]]  ;;  %vm1456_vm10 = vcmask 891904  }
  0xf7   : > { %v406_v12 = vrot.slane %v405_v54, 1  ;;  %v407_v13 = vrot.slane %v405_v54, 2  ;;  %v537_v54 = vrot.slane %v2258_v9, 1  ;;  %s2516_s11 = sld [smem:[#allocation4 + $0x20]] }
  0xf8   : > { %396 = vrot.lane.b32.xlu1 %v394_v56, %s2000_s17  ;;  %499 = vrot.lane.b32.xlu0 %v497_v51, %s3205_s26  ;;  %v538_v56 = vrot.slane %v2258_v9, 2 }
  0xf9   : > { %v409_v27 = vsel %vm408_vm11, %v406_v12, %v407_v13  ;;  %v696_v12 = vstv %s2407_s29  ;;  %s2493_s29 = sld [smem:[#allocation4 + $0x55]] }
  0xfa   : > { %v518_v63 = vpop.permute.xlu0 %517  ;;  %v2332_v0 = vpop.permute.xlu1 %568  ;;  %v411_v34 = vmul.f32 %v409_v27, %v403_v26  ;;  %v1218_v27 = vmul.f32 %v1217_v15, %v2163_v46 }
  0xfb   : > { %v519_v24 = vrot.slane %v518_v63, 1  ;;  %v520_v25 = vrot.slane %v518_v63, 2  ;;  %v534_v63 = vstv %s2392_s19  ;;  %s2470_s19 = sld [smem:[#allocation4 + $0x1a]] }
  0xfc   : > { %429 = vrot.lane.b32.xlu1 %v427_v1, %s2000_s17  ;;  %839 = vrot.lane.b32.xlu0 %v837_v61, %s1981_s20  ;;  %v539_v1 = vsel %vm521_vm12, %v537_v54, %v538_v56  ;;  %v880_v54 = vstv %s2452_s16  ;;  %v1057_v56 = vrot.slane %v2320_v55, 2  ;;  %s2534_s16 = sld [smem:[#allocation4 + $0x1b]] }
  0xfd   : > { %v522_v37 = vsel %vm521_vm12, %v519_v24, %v520_v25  ;;  %v541_v7 = vmul.f32 %v539_v1, %v534_v63  ;;  %v1036_v25 = vstv %s2424_s9  ;;  %s2505_s9 = sld [smem:[#allocation4 + $0x25]]  ;;  %vm319_vm12 = vcmask 654336  }
  0xfe   : > { %v2344_v8 = vpop.permute.xlu0 %697  ;;  %v2346_v10 = vpop.permute.xlu1 %897  ;;  %v524_v45 = vmul.f32 %v522_v37, %v516_v35 }
  0xff   : > { %v699_v9 = vrot.slane %v2344_v8, 1  ;;  %v700_v62 = vrot.slane %v2344_v8, 2  ;;  %v1039_v8 = vrot.slane %v2285_v29, 1 }
 0x100   : > { %345 = vrot.lane.b32.xlu1 %v343_v11, %s2000_s17  ;;  %1190 = vrot.lane.b32.xlu0 %v1188_v6, %s1984_s28  ;;  %v1040_v11 = vrot.slane %v2285_v29, 2 }
 0x101   : > { %v702_v13 = vsel %vm701_vm13, %v699_v9, %v700_v62 }
 0x102   : > { %v2360_v19 = vpop.permute.xlu1 %1245  ;;  %v2362_v20 = vpop.permute.xlu0 %274  ;;  %v704_v29 = vmul.f32 %v702_v13, %v696_v12  ;;  %v1042_v26 = vsel %vm1041_vm14, %v1039_v8, %v1040_v11  ;;  %v899_v11 = vrot.slane %v2346_v10, 1  ;;  %v900_v12 = vrot.slane %v2346_v10, 2 }
 0x104   : > { %380 = vrot.lane.b32.xlu1 %v378_v21, %s2000_s17  ;;  %679 = vrot.lane.b32.xlu0 %v677_v17, %s3205_s26 }
 0x106   : > { %v2374_v32 = vpop.permute.xlu1 %584  ;;  %v2376_v33 = vpop.permute.xlu0 %316 }
 0x108   : > { %413 = vrot.lane.b32.xlu1 %v411_v34, %s2000_s17  ;;  %1019 = vrot.lane.b32.xlu0 %v1017_v30, %s1981_s20  ;;  %s2399_s17 = sld [smem:[#allocation4 + $0x49]]  ;;  %v1398_v30 = vstv %s2431_s12  ;;  %v718_v34 = vrot.slane %v2308_v44, 2  ;;  %s2514_s12 = sld [smem:[#allocation4 + $0x4b]] }
 0x109   : > { %v1399_v44 = vmul.f32 %v1398_v30, %v2176_v52  ;;  %v1247_v30 = vrot.slane %v2360_v19, 1 }
 0x10a   : > { %v2388_v42 = vpop.permute.xlu1 %913  ;;  %v2390_v43 = vpop.permute.xlu0 %551 }
 0x10b   : > { %v553_v21 = vrot.slane %v2390_v43, 1  ;;  %v554_v24 = vrot.slane %v2390_v43, 2 }
 0x10c   : > { %526 = vrot.lane.b32.xlu1 %v524_v45, %s3201_s5  ;;  %1381 = vrot.lane.b32.xlu0 %v1379_v38, %s1984_s28  ;;  %v1044_v38 = vmul.f32 %v1042_v26, %v1036_v25  ;;  %v714_v45 = vstv %s2446_s15  ;;  %v896_v26 = vstv %s2498_s4  ;;  %s2532_s15 = sld [smem:[#allocation4 + $0x2b]]  ;;  %s2559_s4 = sld [smem:[#allocation4 + $0x21]] }
 0x10d   : > { %v556_v43 = vsel %vm555_vm15, %v553_v21, %v554_v24  ;;  %v567_v24 = vstv %s2493_s29  ;;  %s2557_s29 = sld [smem:[#allocation4 + $0x56]] }
 0x10e   : > { %v2401_v51 = vpop.permute.xlu1 %1261  ;;  %v2403_v53 = vpop.permute.xlu0 %881  ;;  %v868_v4 = vstv %s2399_s17  ;;  %s2480_s17 = sld [smem:[#allocation4 + $0x45]]  ;;  %v558_v50 = vmul.f32 %v556_v43, %v550_v41 }
 0x10f   : > { %v871_v14 = vmul.f32 %v869_v3, %v868_v4  ;;  %v883_v39 = vrot.slane %v2403_v53, 1  ;;  %v884_v40 = vrot.slane %v2403_v53, 2  ;;  %v719_v53 = vsel %vm701_vm13, %v717_v31, %v718_v34 }
 0x110   : > { %861 = vrot.lane.b32.xlu1 %v859_v47, %s3205_s26  ;;  %689 = vrot.lane.b32.xlu0 %v687_v48, %s3205_s26  ;;  %v1056_v47 = vrot.slane %v2320_v55, 1  ;;  %v721_v55 = vmul.f32 %v719_v53, %v714_v45  ;;  %v571_v3 = vrot.slane %v2332_v0, 2  ;;  %v586_v45 = vrot.slane %v2374_v32, 1 }
 0x111   : > { %v885_v59 = vsel %vm277_vm0, %v883_v39, %v884_v40  ;;  %v1248_v39 = vrot.slane %v2360_v19, 2  ;;  %v1069_v19 = vstv %s2516_s11  ;;  %s2579_s11 = sld [smem:[#allocation4 + $0x5d]]  ;;  %vm1298_vm13 = vcmask 769024  }
 0x112   : > { %v2416_v60 = vpop.permute.xlu1 %601  ;;  %v2418_v61 = vpop.permute.xlu0 %1228  ;;  %v887_v1 = vmul.f32 %v885_v59, %v880_v54  ;;  %v1058_v4 = vsel %vm1041_vm14, %v1056_v47, %v1057_v56  ;;  %vm709_vm14 = vcmask 646144  }
 0x113   : > { %v1249_v59 = vsel %vm1232_vm1, %v1247_v30, %v1248_v39 }
 0x114   : > { %1210 = vrot.lane.b32.xlu1 %v1208_v57, %s1981_s20  ;;  %1029 = vrot.lane.b32.xlu0 %v1027_v58, %s1981_s20  ;;  %v1230_v57 = vrot.slane %v2418_v61, 1  ;;  %v1231_v58 = vrot.slane %v2418_v61, 2  ;;  %v570_v61 = vrot.slane %v2332_v0, 1  ;;  %v1408_v8 = vstv %s2480_s17  ;;  %s2553_s17 = sld [smem:[#allocation4 + $0x26]] }
 0x115   : > { %v1409_v10 = vmul.f32 %v1408_v8, %v2163_v46 }
 0x116   : > { %v2433_v5 = vpop.permute.xlu1 %929  ;;  %v2435_v6 = vpop.permute.xlu0 %731  ;;  %v572_v25 = vsel %vm555_vm15, %v570_v61, %v571_v3  ;;  %vm1489_vm15 = vcmask 760832  }
 0x117   : > { %v734_v21 = vrot.slane %v2435_v6, 2  ;;  %v574_v34 = vmul.f32 %v572_v25, %v567_v24 }
 0x118   : > { %543 = vrot.lane.b32.xlu1 %v541_v7, %s3201_s5  ;;  %1391 = vrot.lane.b32.xlu0 %v1389_v2, %s1984_s28  ;;  %s2462_s28 = sld [smem:[#allocation4 + $0x4a]]  ;;  %v1227_v2 = vstv %s2470_s19  ;;  %v1233_v7 = vsel %vm1232_vm1, %v1230_v57, %v1231_v58  ;;  %s2549_s19 = sld [smem:[#allocation4 + $0x31]]  ;;  %vm529_vm1 = vcmask 637952  }
 0x119   : > { %v1235_v15 = vmul.f32 %v1233_v7, %v1227_v2 }
 0x11a   : > { %v2448_v17 = vpop.permute.xlu1 %1278  ;;  %v2450_v18 = vpop.permute.xlu0 %1070 }
 0x11b   : > { %v1072_v41 = vrot.slane %v2450_v18, 1  ;;  %v1073_v43 = vrot.slane %v2450_v18, 2  ;;  %v587_v18 = vrot.slane %v2374_v32, 2  ;;  %v583_v32 = vstv %s2532_s15  ;;  %s2593_s15 = sld [smem:[#allocation4 + $0x53]] }
 0x11c   : > { %873 = vrot.lane.b32.xlu1 %v871_v14, %s3205_s26  ;;  %706 = vrot.lane.b32.xlu0 %v704_v29, %s3203_s8  ;;  %v733_v29 = vrot.slane %v2435_v6, 1 }
 0x11d   : > { %v1075_v56 = vsel %vm1074_vm3, %v1072_v41, %v1073_v43 }
 0x11e   : > { %v2466_v35 = vpop.permute.xlu1 %781  ;;  %v2468_v37 = vpop.permute.xlu0 %1419  ;;  %v1053_v9 = vstv %s2462_s28  ;;  %s2544_s28 = sld [smem:[#allocation4]]  ;;  %v736_v40 = vsel %vm735_vm2, %v733_v29, %v734_v21  ;;  %v1077_v3 = vmul.f32 %v1075_v56, %v1069_v19  ;;  %v1260_v29 = vstv %s2559_s4  ;;  %s3242_s4 = smov 78  }
 0x11f   : > { %v1060_v14 = vmul.f32 %v1058_v4, %v1053_v9  ;;  %v1421_v57 = vrot.slane %v2468_v37, 1  ;;  %v1422_v58 = vrot.slane %v2468_v37, 2  ;;  %v1418_v9 = vstv %s2534_s16  ;;  %s2599_s16 = sld [smem:[#allocation4 + $0x4c]] }
 0x120   : > { %1220 = vrot.lane.b32.xlu1 %v1218_v27, %s1981_s20  ;;  %1046 = vrot.lane.b32.xlu0 %v1044_v38, %s3207_s18  ;;  %v901_v27 = vsel %vm277_vm0, %v899_v11, %v900_v12  ;;  %v730_v38 = vstv %s2505_s9  ;;  %s2573_s9 = sld [smem:[#allocation4 + $0x57]]  ;;  %v589_v37 = vsel %vm588_vm4, %v586_v45, %v587_v18  ;;  %v916_v4 = vrot.slane %v2388_v42, 2 }
 0x121   : > { %v903_v53 = vmul.f32 %v901_v27, %v896_v26  ;;  %v738_v54 = vmul.f32 %v736_v40, %v730_v38  ;;  %v1424_v7 = vsel %vm1423_vm5, %v1421_v57, %v1422_v58  ;;  %v1264_v21 = vrot.slane %v2401_v51, 2 }
 0x122   : > { %v2483_v48 = vpop.permute.xlu1 %1120  ;;  %v2485_v49 = vpop.permute.xlu0 %748  ;;  %v1426_v26 = vmul.f32 %v1424_v7, %v1418_v9  ;;  %v603_v45 = vrot.slane %v2416_v60, 1  ;;  %v604_v57 = vrot.slane %v2416_v60, 2  ;;  %v1468_v60 = vstv %s2593_s15  ;;  %s3259_s15 = sld [smem:[#allocation20_spill]] }
 0x123   : > { %v750_v8 = vrot.slane %v2485_v49, 1  ;;  %v751_v11 = vrot.slane %v2485_v49, 2  ;;  %v1263_v49 = vrot.slane %v2401_v51, 1  ;;  %v932_v7 = vrot.slane %v2433_v5, 2 }
 0x124   : > { %1401 = vrot.lane.b32.xlu0 %v1399_v44, %s1981_s20  ;;  %560 = vrot.lane.b32.xlu1 %v558_v50, %s3201_s5  ;;  %v1244_v44 = vstv %s2514_s12  ;;  %s2577_s12 = sld [smem:[#allocation4 + $0x52]]  ;;  %v263_v12 = vstv %s2544_s28  ;;  %s2626_s28 = sld [smem:[#allocation4 + $0x29]] }
 0x125   : > { %v1251_v61 = vmul.f32 %v1249_v59, %v1244_v44  ;;  %v752_v30 = vsel %vm735_vm2, %v750_v8, %v751_v11  ;;  %v264_v39 = vmul.f32 %v263_v12, %v2176_v52  ;;  %v780_v44 = vstv %s2579_s11  ;;  %s3113_s11 = sld [smem:[#allocation4 + $0x62]] }
 0x126   : > { %v2500_v62 = vpop.permute.xlu1 %1469  ;;  %v2502_v63 = vpop.permute.xlu0 %1087  ;;  %v928_v41 = vstv %s2573_s9  ;;  %v1266_v19 = vsel %vm1265_vm7, %v1263_v49, %v1264_v21  ;;  %vm348_vm2 = vcmask 629760  }
 0x127   : > { %v1090_v38 = vrot.slane %v2502_v63, 2  ;;  %v1268_v12 = vmul.f32 %v1266_v19, %v1260_v29 }
 0x128   : > { %723 = vrot.lane.b32.xlu0 %v721_v55, %s3203_s8  ;;  %889 = vrot.lane.b32.xlu1 %v887_v1, %s3205_s26  ;;  %v915_v55 = vrot.slane %v2388_v42, 1  ;;  %v912_v42 = vstv %s2553_s17  ;;  %s2632_s17 = sld [smem:[#allocation4 + $0x2f]] }
 0x12a   : > { %v2520_v0 = vpop.permute.xlu1 %1136  ;;  %v2522_v13 = vpop.permute.xlu0 %1436  ;;  %v917_v27 = vsel %vm298_vm6, %v915_v55, %v916_v4  ;;  %v1277_v43 = vstv %s2577_s12  ;;  %v808_v55 = vstv %s2612_s2  ;;  %v931_v4 = vrot.slane %v2433_v5, 1  ;;  %s3246_s2 = smov 82  }
 0x12b   : > { %v1438_v59 = vrot.slane %v2522_v13, 1  ;;  %v1484_v5 = vstv %s2626_s28  ;;  %v809_v29 = vmul.f32 %v808_v55, %v2176_v52  ;;  %s3260_s28 = sld [smem:[#allocation18_spill]] }
 0x12c   : > { %1062 = vrot.lane.b32.xlu0 %v1060_v14, %s3207_s18  ;;  %1237 = vrot.lane.b32.xlu1 %v1235_v15, %s3209_s13  ;;  %v267_v14 = vstv %s2549_s19  ;;  %v747_v15 = vstv %s2557_s29  ;;  %s2628_s19 = sld [smem:[#allocation4 + $0x27]]  ;;  %s2634_s29 = sld [smem:[#allocation4 + $0x22]]  ;;  %v933_v52 = vsel %vm298_vm6, %v931_v4, %v932_v7  ;;  %v783_v4 = vrot.slane %v2466_v35, 1 }
 0x12d   : > { %v268_v51 = vmul.f32 %v267_v14, %v2163_v46  ;;  %v754_v56 = vmul.f32 %v752_v30, %v747_v15 }
 0x12e   : > { %v2538_v6 = vpop.permute.xlu1 %1485  ;;  %v2540_v31 = vpop.permute.xlu0 %764 }
 0x12f   : > { %v2662_v9 = vadd.f32 %v268_v51, %v264_v39  ;;  %v766_v49 = vrot.slane %v2540_v31, 1  ;;  %v767_v21 = vrot.slane %v2540_v31, 2  ;;  %v1280_v51 = vrot.slane %v2448_v17, 1 }
 0x130   : > { %1411 = vrot.lane.b32.xlu0 %v1409_v10, %s1981_s20  ;;  %576 = vrot.lane.b32.xlu1 %v574_v34, %s3201_s5  ;;  %s2571_s20 = sld [smem:[#allocation4 + $0x5c]]  ;;  %s2585_s5 = sld [smem:[#allocation4 + $0x58]]  ;;  %v591_v10 = vmul.f32 %v589_v37, %v583_v32  ;;  %v1089_v34 = vrot.slane %v2502_v63, 1  ;;  %v1086_v63 = vstv %s2583_s21  ;;  %v1439_v32 = vrot.slane %v2522_v13, 2 }
 0x131   : > { %s2660_s21 = sld [smem:[#allocation4 + $0x5e]]  ;;  %v1435_v37 = vstv %s2599_s16  ;;  %s2700_s16 = sld [smem:[#allocation4 + $0x5f]] }
 0x132   : > { %v2563_v47 = vpop.permute.xlu1 %1327  ;;  %v2565_v50 = vpop.permute.xlu0 %1103  ;;  %v1091_v58 = vsel %vm1074_vm3, %v1089_v34, %v1090_v38  ;;  %v1440_v15 = vsel %vm1423_vm5, %v1438_v59, %v1439_v32  ;;  %v1451_v31 = vstv %s2634_s29  ;;  %v944_v38 = vstv %s2642_s24  ;;  %s2864_s24 = sld [smem:[#allocation4 + $0x5]]  ;;  %s3261_s29 = sshll.u32 %s3259_s15, 3 }
 0x133   : > { %v1093_v14 = vmul.f32 %v1091_v58, %v1086_v63  ;;  %v1106_v58 = vrot.slane %v2565_v50, 2  ;;  %v1293_v59 = vstv %s2652_s23  ;;  %s2856_s23 = sld [smem:[#allocation4 + $0x30]]  ;;  %p3263_p0 = scmp.ne.s32.totalorder %s3260_s28, 0 }
 0x134   : > { %905 = vrot.lane.b32.xlu1 %v903_v53, %s3205_s26  ;;  %740 = vrot.lane.b32.xlu0 %v738_v54, %s3203_s8  ;;  %s2605_s8 = sld [smem:[#allocation4 + $0x2c]]  ;;  %s2607_s26 = sld [smem:[#allocation4 + $0x2e]]  ;;  %v919_v54 = vmul.f32 %v917_v27, %v912_v42  ;;  %v605_v42 = vsel %vm588_vm4, %v603_v45, %v604_v57  ;;  %v1442_v45 = vmul.f32 %v1440_v15, %v1435_v37  ;;  %v1105_v57 = vrot.slane %v2565_v50, 1 }
 0x135   : > { %v992_v37 = vstv %s2669_s22  ;;  %v784_v50 = vrot.slane %v2466_v35, 2  ;;  %s2854_s22 = sld [smem:[#allocation4 + $0x61]] }
 0x136   : > { %v2589_v1 = vpop.permute.xlu1 %1343  ;;  %v2591_v2 = vpop.permute.xlu0 %1452  ;;  %v600_v40 = vstv %s2571_s20  ;;  %v1119_v46 = vstv %s2585_s5  ;;  %s2007_s5 = smov 46   ;;  %s2008_s20 = smov 45  }
 0x137   : > { %v607_v19 = vmul.f32 %v605_v42, %v600_v40  ;;  %v960_v32 = vstv %s2660_s21  ;;  %v988_v40 = vstv %s2667_s7  ;;  %s2002_s7 = smov 51  }
 0x138   : > { %1253 = vrot.lane.b32.xlu1 %v1251_v61, %s3209_s13  ;;  %1079 = vrot.lane.b32.xlu0 %v1077_v3, %s3207_s18  ;;  %s3243_s18 = smov 83   ;;  %s2640_s13 = sld [smem:[#allocation4 + $0x60]]  ;;  %v812_v61 = vstv %s2614_s30 }
 0x139   : > { %s3247_s30 = smov 81  }
 0x13a   : > { %v2618_v24 = vpop.permute.xlu1 %1534  ;;  %v2620_v25 = vpop.permute.xlu0 %945  ;;  %v763_v3 = vstv %s2605_s8  ;;  %v1135_v13 = vstv %s2607_s26  ;;  %s2698_s8 = sld [smem:[#allocation4 + $0x59]]  ;;  %s2004_s26 = smov 49  }
 0x13c   : > { %593 = vrot.lane.b32.xlu1 %v591_v10, %s3242_s4  ;;  %1428 = vrot.lane.b32.xlu0 %v1426_v26, %s3243_s18  ;;  %v1102_v10 = vstv %s2628_s19  ;;  %v2695_v26 = vld [vmem:[#allocation2 + $0x1] ss:$2 sm:$0xf]  ;;  %s2706_s19 = sld [smem:[#allocation4 + $0x2]] }
 0x13d   : > { %v813_v27 = vmul.f32 %v2695_v26, %v812_v61  ;;  %v452_v61 = vstv %s2677_s6  ;;  %s1756_s6 = sld [smem:[#allocation4 + $0x37]] }
 0x13e   : > { %v2650_v18 = vpop.permute.xlu1 %469  ;;  %v2654_v53 = vpop.permute.xlu0 %1294 }
 0x13f   : > { %v2724_v55 = vadd.f32 %v813_v27, %v809_v29  ;;  %v1455_v29 = vrot.slane %v2591_v2, 2  ;;  %v1297_v34 = vrot.slane %v2654_v53, 2 }
 0x140   : > { %921 = vrot.lane.b32.xlu1 %v919_v54, %s3244_s27  ;;  %756 = vrot.lane.b32.xlu0 %v754_v56, %s3245_s25  ;;  %v1281_v54 = vrot.slane %v2448_v17, 2  ;;  %v769_v56 = vsel %vm768_vm8, %v766_v49, %v767_v21  ;;  %v448_v17 = vstv %s2675_s3  ;;  %v1108_v49 = vsel %vm1107_vm9, %v1105_v57, %v1106_v58  ;;  %s2791_s3 = sld [smem:[#allocation4 + $0x5a]] }
 0x141   : > { %v771_v42 = vmul.f32 %v769_v56, %v763_v3  ;;  %v1454_v21 = vrot.slane %v2591_v2, 1  ;;  %v1310_v27 = vstv %s2698_s8  ;;  %v1122_v56 = vrot.slane %v2483_v48, 1  ;;  %s3262_s8 = sld [smem:[#allocation22_spill]] }
 0x142   : > { %v2682_v8 = vpop.permute.xlu1 %479  ;;  %v2684_v11 = vpop.permute.xlu0 %961  ;;  %v1282_v15 = vsel %vm1265_vm7, %v1280_v51, %v1281_v54  ;;  %v628_v2 = vstv %s2706_s19  ;;  %v785_v54 = vsel %vm768_vm8, %v783_v4, %v784_v50  ;;  %v1110_v57 = vmul.f32 %v1108_v49, %v1102_v10  ;;  %s1578_s19 = scalar_lea.sflag [#allocation7], %s3259_s15 }
 0x143   : > { %v287_v4 = vrot.slane %v2283_v28, 1  ;;  %v297_v50 = vrot.slane %v2296_v36, 1  ;;  %v1472_v49 = vrot.slane %v2500_v62, 2 }
 0x144   : > { %1270 = vrot.lane.b32.xlu1 %v1268_v12, %s3246_s2  ;;  %1095 = vrot.lane.b32.xlu0 %v1093_v14, %s3247_s30  ;;  %v935_v14 = vmul.f32 %v933_v52, %v928_v41  ;;  %v2748_v41 = vld [vmem:[#allocation2] ss:$2 sm:$0xf]  ;;  %v993_v52 = vmul.f32 %v2695_v26, %v992_v37  ;;  %v1123_v37 = vrot.slane %v2483_v48, 2  ;;  %v276_v48 = vrot.slane %v2362_v20, 1 }
 0x145   : > { %v989_v3 = vmul.f32 %v2748_v41, %v988_v40  ;;  %v449_v51 = vmul.f32 %v2748_v41, %v448_v17  ;;  %v1284_v40 = vmul.f32 %v1282_v15, %v1277_v43  ;;  %v947_v17 = vrot.slane %v2620_v25, 1 }
 0x146   : > { %v2712_v39 = vpop.permute.xlu1 %819  ;;  %v2714_v63 = vpop.permute.xlu0 %1311  ;;  %v629_v10 = vmul.f32 %v2748_v41, %v628_v2  ;;  %v1471_v15 = vrot.slane %v2500_v62, 1  ;;  %v787_v2 = vmul.f32 %v785_v54, %v780_v44  ;;  %v2797_v54 = vsel %vm298_vm6, %v2296_v36, %v297_v50 }
 0x147   : > { %v994_v62 = vadd.f32 %v993_v52, %v989_v3  ;;  %v278_v3 = vsel %vm277_vm0, %v2362_v20, %v276_v48  ;;  %v964_v20 = vrot.slane %v2684_v11, 2  ;;  %v1487_v50 = vrot.slane %v2538_v6, 1 }
 0x148   : > { %609 = vrot.lane.b32.xlu1 %v607_v19, %s3242_s4  ;;  %1444 = vrot.lane.b32.xlu0 %v1442_v45, %s3243_s18  ;;  %v453_v19 = vmul.f32 %v2695_v26, %v452_v61  ;;  %v632_v45 = vstv %s2708_s10  ;;  %v948_v61 = vrot.slane %v2620_v25, 2  ;;  %s2003_s10 = smov 50   ;;  %s164_s4 = scalar_lea.vmem [#allocation8], %s3261_s29 }
 0x149   : > { %v633_v43 = vmul.f32 %v2695_v26, %v632_v45  ;;  %v1124_v45 = vsel %vm1107_vm9, %v1122_v56, %v1123_v37  ;;  %s1592_s21 = sshll.u32 %s164_s4, 4  ;;  %s3151_s21 = int_to_ptr.vmem [resolvable:$true] %s1592_s21 }
 0x14a   : > { %v2734_v7 = vpop.permute.xlu1 %659  ;;  %v2736_v12 = vpop.permute.xlu0 %1152  ;;  %v949_v35 = vsel %vm319_vm12, %v947_v17, %v948_v61  ;;  %v454_v30 = vadd.f32 %v453_v19, %v449_v51  ;;  %v471_v51 = vrot.slane %v2650_v18, 1  ;;  %v1126_v36 = vmul.f32 %v1124_v45, %v1119_v46 }
 0x14b   : > { %v634_v44 = vadd.f32 %v633_v43, %v629_v10  ;;  %v963_v17 = vrot.slane %v2684_v11, 1  ;;  %v1488_v46 = vrot.slane %v2538_v6, 2  ;;  %v280_v45 = vadd.f32 %v278_v3, %v2662_v9 }
 0x14c   : > { %937 = vrot.lane.b32.xlu1 %v935_v14, %s3244_s27  ;;  %773 = vrot.lane.b32.xlu0 %v771_v42, %s3245_s25  ;;  %v1457_v42 = vsel %vm1456_vm10, %v1454_v21, %v1455_v29  ;;  %v1296_v29 = vrot.slane %v2654_v53, 1  ;;  %v1139_v53 = vrot.slane %v2520_v0, 2  ;;  %v472_v43 = vsel %vm277_vm0, %v2650_v18, %v471_v51 }
 0x14d   : > { %v1459_v21 = vmul.f32 %v1457_v42, %v1451_v31  ;;  %v288_v31 = vsel %vm277_vm0, %v2283_v28, %v287_v4  ;;  %v1138_v42 = vrot.slane %v2520_v0, 1  ;;  %v1473_v28 = vsel %vm1456_vm10, %v1471_v15, %v1472_v49 }
 0x14e   : > { %v1000_v58 = vpop.permute.xlu1 %999  ;;  %v2758_v14 = vpop.permute.xlu0 %1502  ;;  %v951_v0 = vmul.f32 %v949_v35, %v944_v38  ;;  %v1299_v19 = vsel %vm1298_vm13, %v1296_v29, %v1297_v34  ;;  %v1475_v34 = vmul.f32 %v1473_v28, %v1468_v60  ;;  %v481_v35 = vrot.slane %v2682_v8, 1 }
 0x14f   : > { %v1001_v25 = vrot.slane %v1000_v58, 1  ;;  %v1301_v48 = vmul.f32 %v1299_v19, %v1293_v59  ;;  %v965_v6 = vsel %vm319_vm12, %v963_v17, %v964_v20  ;;  %v1314_v29 = vrot.slane %v2714_v63, 2 }
 0x150   : > { %1286 = vrot.lane.b32.xlu1 %v1284_v40, %s3246_s2  ;;  %1112 = vrot.lane.b32.xlu0 %v1110_v57, %s3247_s30  ;;  %v1329_v59 = vrot.slane %v2563_v47, 1  ;;  %v1490_v28 = vsel %vm1489_vm15, %v1487_v50, %v1488_v46  ;;  %v967_v9 = vmul.f32 %v965_v6, %v960_v32  ;;  %v661_v3 = vrot.slane %v2734_v7, 1 }
 0x151   : > { %v1002_v52 = vsel %vm277_vm0, %v1000_v58, %v1001_v25  ;;  %v1140_v58 = vsel %vm709_vm14, %v1138_v42, %v1139_v53  ;;  %v1330_v42 = vrot.slane %v2563_v47, 2  ;;  %v482_v53 = vsel %vm298_vm6, %v2682_v8, %v481_v35 }
 0x152   : > { %v2779_v40 = vpop.permute.xlu1 %669  ;;  %v2781_v57 = vpop.permute.xlu0 %1518  ;;  %v1004_v38 = vadd.f32 %v1002_v52, %v994_v62  ;;  %v1501_v62 = vstv %s2791_s3  ;;  %v1154_v19 = vrot.slane %v2736_v12, 1  ;;  %v1155_v47 = vrot.slane %v2736_v12, 2  ;;  %s1904_s3 = scalar_lea.vmem %s3151_s21, 128 }
 0x153   : > { %v290_v8 = vadd.f32 %v288_v31, %v280_v45  ;;  %v1346_v32 = vrot.slane %v2589_v1, 2  ;;  %v1331_v12 = vsel %vm529_vm1, %v1329_v59, %v1330_v42  ;;  %v821_v17 = vrot.slane %v2712_v39, 1  ;;  %p1905_p9 = scmp.ne.s32.totalorder %s3151_s21, %s1904_s3 }
 0x154   : > { %789 = vrot.lane.b32.xlu1 %v787_v2, %s3245_s25  ;;  %1461 = vrot.lane.b32.xlu0 %v1459_v21, %s3243_s18  ;;  %v1313_v21 = vrot.slane %v2714_v63, 1  ;;  %v671_v31 = vrot.slane %v2779_v40, 1  ;;  %s2866_s25 = sld [smem:[#allocation4 + $0x36]]  ;;  %v1505_v46 = vrot.slane %v2758_v14, 2  ;;  %v3249_v6 = vstv %s2700_s16 }
 0x155   : > { %v1533_v42 = vstv %s2854_s22  ;;  %vm799_vm10 = vcmask 400384   ;;  %p1906_p1 = pnand %p1905_p9, %p3263_p0 }
 0x156   : > { %v1010_v56 = vpop.permute.xlu1 %1009  ;;  %v460_v37 = vpop.permute.xlu0 %459 }
 0x157   : > { %v1011_v61 = vrot.slane %v1010_v56, 1  ;;  %v461_v4 = vrot.slane %v460_v37, 1  ;;  %p1907_p2 = pneg %p1906_p1 }
 0x158   : > { %1128 = vrot.lane.b32.xlu1 %v1126_v36, %s3247_s30  ;;  %953 = vrot.lane.b32.xlu0 %v951_v0, %s3244_s27 }
 0x159   : > { %v1012_v11 = vsel %vm277_vm0, %v1010_v56, %v1011_v61  ;;  %v462_v10 = vsel %vm277_vm0, %v460_v37, %v461_v4  ;;  %v1345_v37 = vrot.slane %v2589_v1, 1  ;;  %v1492_v1 = vmul.f32 %v1490_v28, %v1484_v5 }
 0x15a   : > { %v2825_v15 = vadd.f32 %v1012_v11, %v1004_v38  ;;  %v464_v49 = vadd.f32 %v462_v10, %v454_v30  ;;  %v2827_v25 = vpop.permute.xlu1 %509  ;;  %v640_v60 = vpop.permute.xlu0 %639  ;;  %v1142_v30 = vmul.f32 %v1140_v58, %v1135_v13  ;;  %v1315_v13 = vsel %vm1298_vm13, %v1313_v21, %v1314_v29 }
 0x15b   : > { %v641_v2 = vrot.slane %v640_v60, 1  ;;  %v662_v61 = vsel %vm298_vm6, %v2734_v7, %v661_v3  ;;  %v1156_v38 = vsel %vm709_vm14, %v1154_v19, %v1155_v47  ;;  %v308_v11 = vrot.slane %v2265_v16, 1 }
 0x15c   : > { %v474_v18 = vadd.f32 %v472_v43, %v464_v49  ;;  %1477 = vrot.lane.b32.xlu1 %v1475_v34, %s3243_s18  ;;  %1303 = vrot.lane.b32.xlu0 %v1301_v48, %s3246_s2  ;;  %v1504_v34 = vrot.slane %v2758_v14, 1  ;;  %v3248_v5 = vstv %s2632_s17  ;;  %v1536_v7 = vrot.slane %v2618_v24, 1  ;;  %s1776_s17 = sshll.u32 %s2063_s0, 7  ;;  %s2009_s0 = smov [#allocation8]  }
 0x15d   : > { %v642_v63 = vsel %vm277_vm0, %v640_v60, %v641_v2  ;;  %v1333_v10 = vmul.f32 %v1331_v12, %v3248_v5  ;;  %v822_v48 = vsel %vm277_vm0, %v2712_v39, %v821_v17  ;;  %v672_v14 = vsel %vm298_vm6, %v2779_v40, %v671_v31  ;;  %s3149_s16 = scalar_lea.hbm %s3262_s8, %s1776_s17 }
 0x15e   : > { %v2847_v52 = vpop.permute.xlu1 %849  ;;  %v650_v0 = vpop.permute.xlu0 %649  ;;  %v484_v51 = vadd.f32 %v482_v53, %v474_v18  ;;  %v644_v36 = vadd.f32 %v642_v63, %v634_v44  ;;  %v1317_v44 = vmul.f32 %v1315_v13, %v1310_v27  ;;  %v1347_v27 = vsel %vm529_vm1, %v1345_v37, %v1346_v32 }
 0x15f   : > { %v651_v56 = vrot.slane %v650_v0, 1  ;;  %v1537_v60 = vrot.slane %v2618_v24, 2  ;;  %v1158_v21 = vmul.f32 %v1156_v38, %v3249_v6  ;;  %v1506_v39 = vsel %vm1489_vm15, %v1504_v34, %v1505_v46 }
 0x160   : > { %1144 = vrot.lane.b32.xlu1 %v1142_v30, %s3247_s30  ;;  %969 = vrot.lane.b32.xlu0 %v967_v9, %s3244_s27  ;;  %v1520_v40 = vrot.slane %v2781_v57, 1  ;;  %v1521_v30 = vrot.slane %v2781_v57, 2  ;;  %v301_v24 = vadd.f32 %v2797_v54, %v290_v8  ;;  %v824_v53 = vadd.f32 %v822_v48, %v2724_v55  ;;  %s1755_s27 = sld [smem:[#allocation4 + $0x6]] }
 0x161   : > { %v652_v20 = vsel %vm277_vm0, %v650_v0, %v651_v56  ;;  %v1517_v63 = vstv %s2856_s23  ;;  %v309_v28 = vsel %vm298_vm6, %v2265_v16, %v308_v11  ;;  %v1179_v3 = vstv %s2864_s24 }
 0x162   : > { %v654_v4 = vadd.f32 %v652_v20, %v644_v36  ;;  %v2874_v58 = vpop.permute.xlu1 %1200  ;;  %v490_v50 = vpop.permute.xlu0 %489  ;;  %v1183_v0 = vstv %s2866_s25  ;;  %v318_v57 = vrot.slane %v2376_v33, 1  ;;  %v1508_v54 = vmul.f32 %v1506_v39, %v1501_v62 }
 0x163   : > { %v491_v35 = vrot.slane %v490_v50, 1  ;;  %v1538_v56 = vsel %vm348_vm2, %v1536_v7, %v1537_v60  ;;  %v1522_v8 = vsel %vm348_vm2, %v1520_v40, %v1521_v30  ;;  %v511_v37 = vrot.slane %v2827_v25, 1 }
 0x164   : > { %v664_v43 = vadd.f32 %v662_v61, %v654_v4  ;;  %1494 = vrot.lane.b32.xlu1 %v1492_v1, %s3243_s18  ;;  %1319 = vrot.lane.b32.xlu0 %v1317_v44, %s3246_s2  ;;  %v311_v32 = vadd.f32 %v309_v28, %v301_v24  ;;  %v329_v36 = vrot.slane %v2273_v22, 1  ;;  %v1180_v62 = vmul.f32 %v2748_v41, %v1179_v3 }
 0x165   : > { %v492_v49 = vsel %vm298_vm6, %v490_v50, %v491_v35  ;;  %v1540_v17 = vmul.f32 %v1538_v56, %v1533_v42  ;;  %v1524_v31 = vmul.f32 %v1522_v8, %v1517_v63  ;;  %v1184_v61 = vmul.f32 %v2695_v26, %v1183_v0 }
 0x166   : > { %v494_v29 = vadd.f32 %v492_v49, %v484_v51  ;;  %v2894_v2 = vpop.permute.xlu1 %363  ;;  %v830_v45 = vpop.permute.xlu0 %829  ;;  %v2896_v18 = vadd.f32 %v672_v14, %v664_v43  ;;  %v3250_v51 = vstv %s2640_s13  ;;  %v320_v4 = vsel %vm319_vm12, %v2376_v33, %v318_v57  ;;  %s2005_s13 = smov 48  }
 0x167   : > { %v831_v59 = vrot.slane %v830_v45, 1  ;;  %v1349_v13 = vmul.f32 %v1347_v27, %v3250_v51  ;;  %v512_v50 = vsel %vm319_vm12, %v2827_v25, %v511_v37  ;;  %v851_v38 = vrot.slane %v2847_v52, 1 }
 0x168   : > { %1335 = vrot.lane.b32.xlu1 %v1333_v10, %s3246_s2  ;;  %1160 = vrot.lane.b32.xlu0 %v1158_v21, %s3247_s30  ;;  %v322_v46 = vadd.f32 %v320_v4, %v311_v32  ;;  %v330_v5 = vsel %vm319_vm12, %v2273_v22, %v329_v36  ;;  %v1202_v33 = vrot.slane %v2874_v58, 1  ;;  %v1185_v25 = vadd.f32 %v1184_v61, %v1180_v62 }
 0x169   : > { %v832_v9 = vsel %vm277_vm0, %v830_v45, %v831_v59  ;;  %v852_v7 = vsel %vm298_vm6, %v2847_v52, %v851_v38  ;;  %v365_v48 = vrot.slane %v2894_v2, 7  ;;  %v1374_v62 = vstv %s1756_s6 }
 0x16a   : > { %v834_v19 = vadd.f32 %v832_v9, %v824_v53  ;;  %v397_v55 = vpop.permute.xlu1 %396  ;;  %v500_v47 = vpop.permute.xlu0 %499  ;;  %v332_v60 = vadd.f32 %v330_v5, %v322_v46  ;;  %v1203_v22 = vsel %vm277_vm0, %v2874_v58, %v1202_v33  ;;  %vm979_vm15 = vcmask 392192  }
 0x16b   : > { %v501_v16 = vrot.slane %v500_v47, 1  ;;  %v366_v52 = vsel %vm348_vm2, %v365_v48, %v2894_v2  ;;  %v398_v59 = vrot.slane %v397_v55, 7 }
 0x16c   : > { %1351 = vrot.lane.b32.xlu1 %v1349_v13, %s3246_s2  ;;  %1510 = vrot.lane.b32.xlu0 %v1508_v54, %s3243_s18 }
 0x16d   : > { %v502_v12 = vsel %vm319_vm12, %v500_v47, %v501_v16  ;;  %v399_v51 = vsel %vm348_vm2, %v398_v59, %v397_v55 }
 0x16e   : > { %v504_v20 = vadd.f32 %v502_v12, %v494_v29  ;;  %v430_v1 = vpop.permute.xlu1 %429  ;;  %v840_v44 = vpop.permute.xlu0 %839  ;;  %v1370_v12 = vstv %s1755_s27 }
 0x16f   : > { %v841_v34 = vrot.slane %v840_v44, 1  ;;  %v431_v2 = vrot.slane %v430_v1, 7 }
 0x170   : > { %1542 = vrot.lane.b32.xlu1 %v1540_v17, %s3243_s18  ;;  %1526 = vrot.lane.b32.xlu0 %v1524_v31, %s3243_s18  ;;  %v2933_v35 = vadd.f32 %v512_v50, %v504_v20  ;;  %v1371_v20 = vmul.f32 %v2748_v41, %v1370_v12  ;;  %s2006_s18 = smov 47  }
 0x171   : > { %v842_v11 = vsel %vm298_vm6, %v840_v44, %v841_v34  ;;  %v1375_v44 = vmul.f32 %v2695_v26, %v1374_v62 }
 0x172   : > { %v844_v10 = vadd.f32 %v842_v11, %v834_v19  ;;  %v346_v27 = vpop.permute.xlu1 %345  ;;  %v1191_v43 = vpop.permute.xlu0 %1190 }
 0x173   : > { %v347_v14 = vrot.slane %v346_v27, 7  ;;  %v1192_v49 = vrot.slane %v1191_v43, 1  ;;  %v1376_v46 = vadd.f32 %v1375_v44, %v1371_v20 }
 0x174   : > { %v854_v6 = vadd.f32 %v852_v7, %v844_v10 }
 0x175   : > { %v349_v21 = vsel %vm348_vm2, %v347_v14, %v346_v27  ;;  %v1193_v29 = vsel %vm277_vm0, %v1191_v43, %v1192_v49 }
 0x176   : > { %v351_v45 = vadd.f32 %v349_v21, %v332_v60  ;;  %v1195_v39 = vadd.f32 %v1193_v29, %v1185_v25  ;;  %v381_v40 = vpop.permute.xlu1 %380  ;;  %v680_v30 = vpop.permute.xlu0 %679 }
 0x177   : > { %v382_v24 = vrot.slane %v381_v40, 7  ;;  %v681_v42 = vrot.slane %v680_v30, 1 }
 0x178   : > { %v368_v53 = vadd.f32 %v366_v52, %v351_v45  ;;  %v1205_v63 = vadd.f32 %v1203_v22, %v1195_v39 }
 0x179   : > { %v383_v28 = vsel %vm348_vm2, %v382_v24, %v381_v40  ;;  %v682_v9 = vsel %vm319_vm12, %v680_v30, %v681_v42 }
 0x17a   : > { %v385_v3 = vadd.f32 %v383_v28, %v368_v53  ;;  %v2951_v58 = vadd.f32 %v682_v9, %v2896_v18  ;;  %v414_v0 = vpop.permute.xlu1 %413  ;;  %v1020_v57 = vpop.permute.xlu0 %1019  ;;  %v432_v18 = vsel %vm348_vm2, %v431_v2, %v430_v1 }
 0x17b   : > { %v415_v13 = vrot.slane %v414_v0, 7  ;;  %v1021_v54 = vrot.slane %v1020_v57, 1 }
 0x17c   : > { %v401_v19 = vadd.f32 %v399_v51, %v385_v3 }
 0x17d   : > { %v416_v47 = vsel %vm348_vm2, %v415_v13, %v414_v0  ;;  %v1022_v56 = vsel %vm298_vm6, %v1020_v57, %v1021_v54 }
 0x17e   : > { %v418_v8 = vadd.f32 %v416_v47, %v401_v19  ;;  %v1024_v37 = vadd.f32 %v1022_v56, %v2825_v15  ;;  %v527_v16 = vpop.permute.xlu1 %526  ;;  %v1382_v32 = vpop.permute.xlu0 %1381 }
 0x17f   : > { %v1383_v61 = vrot.slane %v1382_v32, 1 }
 0x180   : > { %v434_v36 = vadd.f32 %v432_v18, %v418_v8 }
 0x181   : > { %v1384_v11 = vsel %vm277_vm0, %v1382_v32, %v1383_v61 }
 0x182   : > { %v862_v17 = vpop.permute.xlu1 %861  ;;  %v2958_v55 = vpop.permute.xlu0 %689  ;;  %436 = vrot.lane.b32.xlu0 %v434_v36, %s2002_s7  ;;  %v1386_v43 = vadd.f32 %v1384_v11, %v1376_v46 }
 0x183   : > { %v863_v31 = vrot.slane %v862_v17, 7  ;;  %v691_v18 = vrot.slane %v2958_v55, 1 }
 0x185   : > { %v864_v15 = vsel %vm319_vm12, %v863_v31, %v862_v17 }
 0x186   : > { %v2963_v4 = vadd.f32 %v864_v15, %v854_v6  ;;  %v1211_v50 = vpop.permute.xlu1 %1210  ;;  %v1030_v1 = vpop.permute.xlu0 %1029 }
 0x187   : > { %v1212_v38 = vrot.slane %v1211_v50, 1  ;;  %v1031_v34 = vrot.slane %v1030_v1, 1 }
 0x189   : > { %v1213_v5 = vsel %vm298_vm6, %v1211_v50, %v1212_v38  ;;  %v1032_v33 = vsel %vm298_vm6, %v1030_v1, %v1031_v34 }
 0x18a   : > { %v2968_v10 = vadd.f32 %v1213_v5, %v1205_v63  ;;  %v2970_v41 = vadd.f32 %v1032_v33, %v1024_v37  ;;  %v544_v26 = vpop.permute.xlu1 %543  ;;  %v1392_v27 = vpop.permute.xlu0 %1391  ;;  %v528_v63 = vrot.slane %v527_v16, 7 }
 0x18b   : > { %v1393_v25 = vrot.slane %v1392_v27, 1  ;;  %v545_v3 = vrot.slane %v544_v26, 7 }
 0x18c   : > { %v530_v0 = vsel %vm529_vm1, %v528_v63, %v527_v16 }
 0x18d   : > { %v1394_v7 = vsel %vm277_vm0, %v1392_v27, %v1393_v25  ;;  %v546_v13 = vsel %vm529_vm1, %v545_v3, %v544_v26  ;;  %v532_v19 = vadd.f32 %v530_v0, %v2933_v35  ;;  %v692_v35 = vsel %vm319_vm12, %v2958_v55, %v691_v18 }
 0x18e   : > { %v2973_v48 = vadd.f32 %v1394_v7, %v1386_v43  ;;  %v2975_v14 = vpop.permute.xlu1 %873  ;;  %v707_v49 = vpop.permute.xlu0 %706  ;;  %v694_v34 = vadd.f32 %v692_v35, %v2951_v58 }
 0x18f   : > { %v548_v8 = vadd.f32 %v546_v13, %v532_v19  ;;  %v708_v12 = vrot.slane %v707_v49, 7 }
 0x191   : > { %v710_v50 = vsel %vm709_vm14, %v708_v12, %v707_v49 }
 0x192   : > { %v2977_v60 = vpop.permute.xlu1 %1220  ;;  %v2979_v6 = vpop.permute.xlu0 %1046  ;;  %v712_v27 = vadd.f32 %v710_v50, %v694_v34 }
 0x193   : > { %v1048_v19 = vrot.slane %v2979_v6, 7 }
 0x196   : > { %v561_v21 = vpop.permute.xlu1 %560  ;;  %v2981_v29 = vpop.permute.xlu0 %1401 }
 0x197   : > { %v562_v57 = vrot.slane %v561_v21, 7 }
 0x199   : > { %v563_v47 = vsel %vm529_vm1, %v562_v57, %v561_v21  ;;  %v875_v21 = vrot.slane %v2975_v14, 7 }
 0x19a   : > { %v2983_v22 = vpop.permute.xlu1 %889  ;;  %v724_v45 = vpop.permute.xlu0 %723  ;;  %v565_v36 = vadd.f32 %v563_v47, %v548_v8  ;;  %v1403_v47 = vrot.slane %v2981_v29, 1 }
 0x19b   : > { %v725_v44 = vrot.slane %v724_v45, 7  ;;  %v876_v57 = vsel %vm319_vm12, %v875_v21, %v2975_v14 }
 0x19d   : > { %v726_v33 = vsel %vm709_vm14, %v725_v44, %v724_v45  ;;  %v891_v45 = vrot.slane %v2983_v22, 7 }
 0x19e   : > { %v2985_v39 = vpop.permute.xlu1 %1237  ;;  %v2987_v40 = vpop.permute.xlu0 %1062  ;;  %v728_v43 = vadd.f32 %v726_v33, %v712_v27 }
 0x19f   : > { %v892_v8 = vsel %vm319_vm12, %v891_v45, %v2983_v22  ;;  %v1239_v18 = vrot.slane %v2985_v39, 7  ;;  %v1064_v12 = vrot.slane %v2987_v40, 7  ;;  %v1049_v22 = vsel %vm768_vm8, %v1048_v19, %v2979_v6 }
 0x1a2   : > { %v577_v30 = vpop.permute.xlu1 %576  ;;  %v2989_v52 = vpop.permute.xlu0 %1411 }
 0x1a3   : > { %v578_v54 = vrot.slane %v577_v30, 7  ;;  %v1413_v6 = vrot.slane %v2989_v52, 1 }
 0x1a5   : > { %v579_v16 = vsel %vm529_vm1, %v578_v54, %v577_v30  ;;  %v1222_v30 = vrot.slane %v2977_v60, 1 }
 0x1a6   : > { %v2991_v59 = vpop.permute.xlu1 %905  ;;  %v741_v24 = vpop.permute.xlu0 %740  ;;  %v581_v17 = vadd.f32 %v579_v16, %v565_v36  ;;  %v878_v36 = vadd.f32 %v876_v57, %v2963_v4  ;;  %v1240_v4 = vsel %vm588_vm4, %v1239_v18, %v2985_v39 }
 0x1a7   : > { %v742_v1 = vrot.slane %v741_v24, 7  ;;  %v907_v13 = vrot.slane %v2991_v59, 7 }
 0x1a9   : > { %v743_v55 = vsel %vm709_vm14, %v742_v1, %v741_v24 }
 0x1aa   : > { %v2993_v42 = vpop.permute.xlu1 %1253  ;;  %v2995_v53 = vpop.permute.xlu0 %1079  ;;  %v745_v63 = vadd.f32 %v743_v55, %v728_v43 }
 0x1ab   : > { %v1081_v50 = vrot.slane %v2995_v53, 7 }
 0x1ae   : > { %v594_v28 = vpop.permute.xlu1 %593  ;;  %v2997_v9 = vpop.permute.xlu0 %1428 }
 0x1af   : > { %v595_v56 = vrot.slane %v594_v28, 7 }
 0x1b1   : > { %v596_v62 = vsel %vm529_vm1, %v595_v56, %v594_v28 }
 0x1b2   : > { %v3000_v51 = vpop.permute.xlu1 %921  ;;  %v757_v2 = vpop.permute.xlu0 %756  ;;  %v598_v15 = vadd.f32 %v596_v62, %v581_v17 }
 0x1b3   : > { %v758_v26 = vrot.slane %v757_v2, 7  ;;  %v923_v16 = vrot.slane %v3000_v51, 7 }
 0x1b5   : > { %v759_v58 = vsel %vm709_vm14, %v758_v26, %v757_v2  ;;  %v1223_v2 = vsel %vm298_vm6, %v2977_v60, %v1222_v30 }
 0x1b6   : > { %v3005_v37 = vpop.permute.xlu1 %1270  ;;  %v3007_v32 = vpop.permute.xlu0 %1095  ;;  %v761_v3 = vadd.f32 %v759_v58, %v745_v63  ;;  %v1225_v44 = vadd.f32 %v1223_v2, %v2968_v10  ;;  %v1065_v10 = vsel %vm768_vm8, %v1064_v12, %v2987_v40 }
 0x1b7   : > { %v1097_v39 = vrot.slane %v3007_v32, 7  ;;  %v1272_v40 = vrot.slane %v3005_v37, 7 }
 0x1b8   : > { %v1242_v26 = vadd.f32 %v1240_v4, %v1225_v44 }
 0x1b9   : > { %v1098_v45 = vsel %vm768_vm8, %v1097_v39, %v3007_v32  ;;  %v1273_v57 = vsel %vm588_vm4, %v1272_v40, %v3005_v37 }
 0x1ba   : > { %v610_v31 = vpop.permute.xlu1 %609  ;;  %v3012_v20 = vpop.permute.xlu0 %1444 }
 0x1bb   : > { %v611_v61 = vrot.slane %v610_v31, 7 }
 0x1bd   : > { %v612_v38 = vsel %vm529_vm1, %v611_v61, %v610_v31  ;;  %v908_v31 = vsel %vm319_vm12, %v907_v13, %v2991_v59  ;;  %v1404_v61 = vsel %vm298_vm6, %v2981_v29, %v1403_v47  ;;  %v924_v59 = vsel %vm319_vm12, %v923_v16, %v3000_v51 }
 0x1be   : > { %v614_v46 = vadd.f32 %v612_v38, %v598_v15  ;;  %v938_v11 = vpop.permute.xlu1 %937  ;;  %v774_v5 = vpop.permute.xlu0 %773  ;;  %v894_v15 = vadd.f32 %v892_v8, %v878_v36  ;;  %v1255_v29 = vrot.slane %v2993_v42, 7  ;;  %v1406_v51 = vadd.f32 %v1404_v61, %v2973_v48 }
 0x1bf   : > { %v775_v25 = vrot.slane %v774_v5, 7  ;;  %v939_v35 = vrot.slane %v938_v11, 7  ;;  %v1430_v48 = vrot.slane %v2997_v9, 7 }
 0x1c0   : > { %616 = vrot.lane.b32.xlu1 %v614_v46, %s2003_s10  ;;  %v910_v38 = vadd.f32 %v908_v31, %v894_v15 }
 0x1c1   : > { %v776_v28 = vsel %vm709_vm14, %v775_v25, %v774_v5  ;;  %v1051_v5 = vadd.f32 %v1049_v22, %v2970_v41  ;;  %v940_v33 = vsel %vm319_vm12, %v939_v35, %v938_v11  ;;  %v1082_v25 = vsel %vm768_vm8, %v1081_v50, %v2995_v53 }
 0x1c2   : > { %v3021_v7 = vpop.permute.xlu1 %1286  ;;  %v3023_v49 = vpop.permute.xlu0 %1112  ;;  %v778_v56 = vadd.f32 %v776_v28, %v761_v3  ;;  %v926_v27 = vadd.f32 %v924_v59, %v910_v38  ;;  %v1414_v41 = vsel %vm298_vm6, %v2989_v52, %v1413_v6  ;;  %v1256_v11 = vsel %vm588_vm4, %v1255_v29, %v2993_v42 }
 0x1c3   : > { %v1067_v55 = vadd.f32 %v1065_v10, %v1051_v5  ;;  %v1114_v43 = vrot.slane %v3023_v49, 7  ;;  %v1288_v53 = vrot.slane %v3021_v7, 7  ;;  %v1446_v52 = vrot.slane %v3012_v20, 7 }
 0x1c4   : > { %v942_v58 = vadd.f32 %v940_v33, %v926_v27  ;;  %v1258_v47 = vadd.f32 %v1256_v11, %v1242_v26  ;;  %v1431_v37 = vsel %vm408_vm11, %v1430_v48, %v2997_v9  ;;  %v1416_v12 = vadd.f32 %v1414_v41, %v1406_v51 }
 0x1c5   : > { %v1115_v42 = vsel %vm768_vm8, %v1114_v43, %v3023_v49  ;;  %v1447_v31 = vsel %vm408_vm11, %v1446_v52, %v3012_v20  ;;  %v256_v52 = vld [vmem:[%s3194_s1] sm:$0x3]  ;;  %vm619_vm6 = vcmask 408576  }
 0x1c6   : > { %v790_v0 = vpop.permute.xlu1 %789  ;;  %v3030_v24 = vpop.permute.xlu0 %1461  ;;  %v1433_v22 = vadd.f32 %v1431_v37, %v1416_v12  ;;  %vm259_vm0 = vcmp.ge.s32.totalorder %v256_v52, 3  ;;  %vm260_vm3 = vcmp.lt.s32.totalorder %v256_v52, 19  ;;  %vm444_vm5 = vcmp.ge.s32.totalorder %v256_v52, 2 }
 0x1c7   : > { %v791_v54 = vrot.slane %v790_v0, 7  ;;  %vm3115_vm7 = vmand %vm259_vm0, %vm260_vm3  ;;  %vm625_vm9 = vcmp.lt.s32.totalorder %v256_v52, 17  ;;  %vm804_vm13 = vcmp.ge.s32.totalorder %v256_v52, 0  ;;  %vm984_vm2 = vcmp.ge.s32.totalorder %v256_v52, 4294967295 }
 0x1c8   : > { %v1449_v20 = vadd.f32 %v1447_v31, %v1433_v22  ;;  %vm985_vm0 = vcmp.lt.s32.totalorder %v256_v52, 15  ;;  %vm1170_vm3 = vcmask 384000  }
 0x1c9   : > { %v792_v14 = vsel %vm709_vm14, %v791_v54, %v790_v0  ;;  %v1084_v0 = vadd.f32 %v1082_v25, %v1067_v55  ;;  %vm805_vm14 = vcmp.lt.s32.totalorder %v256_v52, 16 }
 0x1ca   : > { %v794_v62 = vadd.f32 %v792_v14, %v778_v56  ;;  %v1129_v60 = vpop.permute.xlu1 %1128  ;;  %v954_v17 = vpop.permute.xlu0 %953  ;;  %v1463_v56 = vrot.slane %v3030_v24, 7  ;;  %v1289_v14 = vsel %vm588_vm4, %v1288_v53, %v3021_v7 }
 0x1cb   : > { %v955_v1 = vrot.slane %v954_v17, 7  ;;  %v1130_v28 = vrot.slane %v1129_v60, 7  ;;  %v1100_v32 = vadd.f32 %v1098_v45, %v1084_v0 }
 0x1cc   : > { %796 = vrot.lane.b32.xlu0 %v794_v62, %s2004_s26  ;;  %v1275_v62 = vadd.f32 %v1273_v57, %v1258_v47  ;;  %v1464_v7 = vsel %vm408_vm11, %v1463_v56, %v3030_v24 }
 0x1cd   : > { %v956_v21 = vsel %vm319_vm12, %v955_v1, %v954_v17  ;;  %v1131_v36 = vsel %vm768_vm8, %v1130_v28, %v1129_v60  ;;  %v1117_v17 = vadd.f32 %v1115_v42, %v1100_v32  ;;  %v1466_v39 = vadd.f32 %v1464_v7, %v1449_v20 }
 0x1ce   : > { %v3062_v34 = vpop.permute.xlu1 %1477  ;;  %v1304_v46 = vpop.permute.xlu0 %1303  ;;  %v958_v13 = vadd.f32 %v956_v21, %v942_v58  ;;  %v1291_v61 = vadd.f32 %v1289_v14, %v1275_v62 }
 0x1cf   : > { %v1305_v54 = vrot.slane %v1304_v46, 7  ;;  %v1479_v35 = vrot.slane %v3062_v34, 7  ;;  %v1133_v60 = vadd.f32 %v1131_v36, %v1117_v17 }
 0x1d1   : > { %v1306_v44 = vsel %vm588_vm4, %v1305_v54, %v1304_v46  ;;  %v1480_v29 = vsel %vm408_vm11, %v1479_v35, %v3062_v34 }
 0x1d2   : > { %v1145_v30 = vpop.permute.xlu1 %1144  ;;  %v970_v63 = vpop.permute.xlu0 %969  ;;  %v1308_v6 = vadd.f32 %v1306_v44, %v1291_v61  ;;  %v1482_v25 = vadd.f32 %v1480_v29, %v1466_v39 }
 0x1d3   : > { %v971_v3 = vrot.slane %v970_v63, 7  ;;  %v1146_v2 = vrot.slane %v1145_v30, 7 }
 0x1d5   : > { %v972_v19 = vsel %vm319_vm12, %v971_v3, %v970_v63  ;;  %v1147_v9 = vsel %vm768_vm8, %v1146_v2, %v1145_v30 }
 0x1d6   : > { %v974_v8 = vadd.f32 %v972_v19, %v958_v13  ;;  %v1495_v18 = vpop.permute.xlu1 %1494  ;;  %v1320_v16 = vpop.permute.xlu0 %1319  ;;  %v1149_v38 = vadd.f32 %v1147_v9, %v1133_v60 }
 0x1d7   : > { %v1321_v49 = vrot.slane %v1320_v16, 7  ;;  %v1496_v50 = vrot.slane %v1495_v18, 7 }
 0x1d8   : > { %976 = vrot.lane.b32.xlu1 %v974_v8, %s2005_s13  ;;  %v258_v8 = vstv %s3113_s11 }
 0x1d9   : > { %v1322_v59 = vsel %vm588_vm4, %v1321_v49, %v1320_v16  ;;  %v1497_v27 = vsel %vm408_vm11, %v1496_v50, %v1495_v18 }
 0x1da   : > { %v1336_v15 = vpop.permute.xlu1 %1335  ;;  %v1161_v4 = vpop.permute.xlu0 %1160  ;;  %v1324_v24 = vadd.f32 %v1322_v59, %v1308_v6  ;;  %v1499_v41 = vadd.f32 %v1497_v27, %v1482_v25  ;;  %v1571_v27 = vsub.s32 1, %v2160_v23 }
 0x1db   : > { %v1337_v1 = vrot.slane %v1336_v15, 7  ;;  %v1162_v10 = vrot.slane %v1161_v4, 7 }
 0x1dd   : > { %v1338_v46 = vsel %vm588_vm4, %v1337_v1, %v1336_v15  ;;  %v1163_v5 = vsel %vm768_vm8, %v1162_v10, %v1161_v4  ;;  %vm624_vm8 = vcmp.ge.s32.totalorder %v256_v52, 1 }
 0x1de   : > { %v1165_v33 = vadd.f32 %v1163_v5, %v1149_v38  ;;  %v1352_v51 = vpop.permute.xlu1 %1351  ;;  %v1511_v26 = vpop.permute.xlu0 %1510  ;;  %v1340_v43 = vadd.f32 %v1338_v46, %v1324_v24  ;;  %vm3126_vm1 = vmand %vm624_vm8, %vm625_vm9  ;;  %vm1366_vm9 = vcmp.ge.s32.totalorder %v256_v52, 4294967293 }
 0x1df   : > { %v1353_v40 = vrot.slane %v1352_v51, 7  ;;  %v1512_v55 = vrot.slane %v1511_v26, 7 }
 0x1e0   : > { %1167 = vrot.lane.b32.xlu0 %v1165_v33, %s2006_s18 }
 0x1e1   : > { %v1354_v21 = vsel %vm588_vm4, %v1353_v40, %v1352_v51  ;;  %v1513_v34 = vsel %vm408_vm11, %v1512_v55, %v1511_v26  ;;  %vm439_vm4 = vcmask 416768   ;;  %v1567_v26 = vsub.s32 0, %v2160_v23 }
 0x1e2   : > { %v1356_v11 = vadd.f32 %v1354_v21, %v1340_v43  ;;  %v1543_v48 = vpop.permute.xlu1 %1542  ;;  %v1527_v58 = vpop.permute.xlu0 %1526  ;;  %v1515_v45 = vadd.f32 %v1513_v34, %v1499_v41  ;;  %v1563_v43 = vld [vmem:[%s2153_s14] sm:$0xff]  ;;  %s1908_s14 = sshll.u32 %s2009_s0, 4  ;;  %s1909_s14 = int_to_ptr.vmem [resolvable:$false] %s1908_s14 }
 0x1e3   : > { %v1544_v30 = vrot.slane %v1543_v48, 7  ;;  %v1528_v63 = vrot.slane %v1527_v58, 7  ;;  %s1910_s22 = scalar_lea.vmem %s1909_s14, 256  ;;  %p1911_p10 = scmp.lt.s32.totalorder %s3151_s21, %s1909_s14 }
 0x1e4   : > { %1358 = vrot.lane.b32.xlu1 %v1356_v11, %s2007_s5  ;;  %p1912_p13 = scmp.lt.s32.totalorder %s1910_s22, %s1904_s3 }
 0x1e5   : > { %v1529_v53 = vsel %vm408_vm11, %v1528_v63, %v1527_v58  ;;  %v1545_v3 = vsel %vm408_vm11, %v1544_v30, %v1543_v48  ;;  %vm445_vm11 = vcmp.lt.s32.totalorder %v256_v52, 18 }
 0x1e6   : > { %v1531_v28 = vadd.f32 %v1529_v53, %v1515_v45  ;;  %vm3120_vm12 = vmand %vm444_vm5, %vm445_vm11  ;;  %vm1175_vm5 = vcmp.ge.s32.totalorder %v256_v52, 4294967294  ;;  %vm1176_vm11 = vcmp.lt.s32.totalorder %v256_v52, 14  ;;  %p1913_p5 = por %p1912_p13, %p1911_p10 }
 0x1e7   : > { %vm1177_vm8 = vmand %vm1175_vm5, %vm1176_vm11 }
 0x1e8   : > { %v1547_v0 = vadd.f32 %v1545_v3, %v1531_v28  ;;  %p1914_p7 = pnand %p1913_p5, %p1907_p2 }
 0x1ea   : > { %1549 = vrot.lane.b32.xlu0 %v1547_v0, %s2008_s20 }
 0x1f4   : > { %v437_v57 = vpop.permute.xlu0 %436 }
 0x1f5   : > { %v438_v42 = vrot.slane %v437_v57, 1 }
 0x1f7   : > { %v440_v32 = vsel %vm439_vm4, %v437_v57, %v438_v42  ;;  %vm3132_vm4 = vmand %vm804_vm13, %vm805_vm14 }
 0x1f8   : > { %v442_v14 = vsel %vm3115_vm7, %v440_v32, 0.0  ;;  %vm986_vm7 = vmand %vm984_vm2, %vm985_vm0 }
 0x1f9   : > { %v443_v31 = vadd.f32 %v442_v14, %v258_v8 }
 0x232   : > { %v617_v13 = vpop.permute.xlu1 %616 }
 0x233   : > { %v618_v2 = vrot.slane %v617_v13, 1 }
 0x235   : > { %v620_v16 = vsel %vm619_vm6, %v617_v13, %v618_v2  ;;  %vm1361_vm6 = vcmask 375808  }
 0x236   : > { %v622_v17 = vsel %vm3120_vm12, %v620_v16, 0.0  ;;  %vm1552_vm12 = vcmask 367616  }
 0x237   : > { %v623_v61 = vadd.f32 %v622_v17, %v443_v31 }
 0x23e   : > { %v797_v54 = vpop.permute.xlu0 %796 }
 0x23f   : > { %v798_v56 = vrot.slane %v797_v54, 1 }
 0x241   : > { %v800_v12 = vsel %vm799_vm10, %v797_v54, %v798_v56  ;;  %vm1367_vm10 = vcmp.lt.s32.totalorder %v256_v52, 13 }
 0x242   : > { %v802_v9 = vsel %vm3126_vm1, %v800_v12, 0.0  ;;  %vm1368_vm13 = vmand %vm1366_vm9, %vm1367_vm10 }
 0x243   : > { %v803_v4 = vadd.f32 %v802_v9, %v623_v61 }
 0x24a   : > { %v977_v19 = vpop.permute.xlu1 %976 }
 0x24b   : > { %v978_v37 = vrot.slane %v977_v19, 1 }
 0x24d   : > { %v980_v44 = vsel %vm979_vm15, %v977_v19, %v978_v37 }
 0x24e   : > { %v982_v15 = vsel %vm3132_vm4, %v980_v44, 0.0 }
 0x24f   : > { %v983_v1 = vadd.f32 %v982_v15, %v803_v4 }
 0x252   : > { %v1168_v36 = vpop.permute.xlu0 %1167 }
 0x253   : > { %v1169_v62 = vrot.slane %v1168_v36, 1 }
 0x255   : > { %v1171_v7 = vsel %vm1170_vm3, %v1168_v36, %v1169_v62 }
 0x256   : > { %v1359_v22 = vpop.permute.xlu1 %1358  ;;  %v1173_v59 = vsel %vm986_vm7, %v1171_v7, 0.0 }
 0x257   : > { %v1360_v60 = vrot.slane %v1359_v22, 1  ;;  %v1174_v6 = vadd.f32 %v1173_v59, %v983_v1 }
 0x259   : > { %v1362_v50 = vsel %vm1361_vm6, %v1359_v22, %v1360_v60 }
 0x25a   : > { %v1364_v10 = vsel %vm1177_vm8, %v1362_v50, 0.0 }
 0x25b   : > { %v1365_v29 = vadd.f32 %v1364_v10, %v1174_v6 }
 0x25c   : > { %v1550_v20 = vpop.permute.xlu0 %1549 }
 0x25d   : > { %v1551_v38 = vrot.slane %v1550_v20, 1 }
 0x25f   : > { %v1553_v46 = vsel %vm1552_vm12, %v1550_v20, %v1551_v38 }
 0x260   : > { %v1555_v5 = vsel %vm1368_vm13, %v1553_v46, 0.0 }
 0x261   : > { %v1556_v39 = vadd.f32 %v1555_v5, %v1365_v29 }
 0x263   : > { %v1769_v24 = vmul.f32 -1.442695, %v1556_v39 }
 0x265   : > { %1858 = vpow2.f32 %v1769_v24 }
 0x26f   : > { %v1859_v33 = vpop.eup %1858 }
 0x270   : > { %v1560_v51 = vadd.f32 1.0, %v1859_v33 }
 0x272   : > { %1860 = vrcp.f32 %v1560_v51 }
 0x27c   : > { %v1861_v40 = vpop.eup %1860 }
 0x27d   : > { %v1568_v55 = vrot.slane %v1861_v40, %v1567_v26  ;;  %v1572_v25 = vrot.slane %v1861_v40, %v1571_v27 }
 0x27f   : > { %v1573_v21 = vcombine.low %v1568_v55, %v1572_v25 }
 0x281   : > { %v1575_v34 = vmul.f32 %v1573_v21, %v1563_v43 }
 0x283   : > { %1576 = vst [vmem:[%s164_s4] sm:$0xff] %v1575_v34 }
 0x284   : > { %1917 = shalt.err (!%p1914_p7)
}
 0x285   : > { %s1918_s23 = scalar_lea.hbm %s3149_s16, 128  ;;  %s1922_s27 = scalar_lea.hbm %s3262_s8, 256 }
 0x286   : > { %p1919_p8 = scmp.ne.s32.totalorder %s3149_s16, %s1918_s23  ;;  %p1923_p3 = scmp.lt.u32.totalorder %s3149_s16, %s3262_s8 }
 0x287   : > { %p1924_p4 = scmp.lt.u32.totalorder %s1922_s27, %s1918_s23  ;;  %p1926_p9 = scmp.lt.u32.totalorder %s1918_s23, %s3149_s16 }
 0x288   : > { %p1920_p11 = pnand %p1919_p8, %p3263_p0 }
 0x289   : > { %p1925_p6 = por %p1924_p4, %p1923_p3 }
 0x28a   : > { %p1921_p12 = pneg %p1920_p11 }
 0x28b   : > { %p1927_p1 = por %p1926_p9, %p1925_p6 }
 0x28d   : > { %p1928_p2 = pnand %p1927_p1, %p1921_p12 }
 0x28f   : > { %1931 = shalt.err (!%p1928_p2)
}
 0x290   : > { %1779 = dma.vmem_to_hbm [thread:$0]  (%p3263_p0), %s3151_s21, 128, %s3149_s16, %s1578_s19  }
 0x291 PF: > { %s3264_s10 = sld [smem:[#allocation12_spill]]  ;;  %s3265_s26 = sld [smem:[#allocation19_spill]] }
 0x292   : > { %s3266_s13 = sld [smem:[#allocation15_spill]] }
 0x297   : > { %s1604_s18 = sand.u32 1, %s3264_s10   ;;  %p3267_p10 = scmp.ne.s32.totalorder %s3265_s26, 0 }
 0x298   : > { %p3268_p13 = scmp.ge.s32.totalorder %s3266_s13, 2  ;;  %s1605_s5 = scalar_lea.sflag [#allocation7], %s1604_s18 }
 0x29a   : > { %p1786_p5 = pnand %p3268_p13, %p3267_p10 }
 0x29c   : > { %1955 = dma.done.wait (!%p1786_p5), %s1605_s5, 128  }
 0x29d   : > { %1957 = vsyncadd (!%p1786_p5), %s1605_s5, 4294967168  ;;  %s3269_s25 = sld [smem:[#allocation16_spill]]  ;;  %s3270_s22 = sld [smem:[#allocation13_spill]] }
 0x29e   : > { %s3271_s23 = sld [smem:[#allocation14_spill]]  ;;  %s3272_s24 = sld [smem:[#allocation17_spill]] }
 0x2a3   : > { %p20_p7 = scmp.ge.s32.totalorder %s3269_s25, 4  }
 0x2a5   :  { %22 = sbr.rel (!%p20_p7) target bundleno = 18 (0x12), region = 76 }
 0x2ac   :  { %1610 = vsyncpa [#allocation6], 1 }
 0x2ad   :  { %1612 = vsyncpa [#allocation6 + $0x1], 1 }
 0x2ae   :  { %1613 = vsyncpa [#allocation7], 1 }
 0x2af   :  { %1615 = vsyncpa [#allocation7 + $0x1], 1 }

</bundles_post_ra>
